<compile_context>
chip_gen: v7x
topology: tpu7x:2x2x1
jax: 0.10.0
libtpu: 0.0.40
codegen_flags: <defaults>
</compile_context>

<pallas_src>
import jax
import jax.numpy as jnp
from jax.experimental import pallas as pl
from jax.experimental.pallas import tpu as pltpu


# -------------------- config (mirrors cfg.MODEL.POINT_HEAD) --------------------
FC_DIM = 32                    # cfg.MODEL.POINT_HEAD.FC_DIM
NUM_FC = 3                     # cfg.MODEL.POINT_HEAD.NUM_FC
CLS_AGNOSTIC_MASK = False      # cfg.MODEL.POINT_HEAD.CLS_AGNOSTIC_MASK
COARSE_PRED_EACH_LAYER = True  # cfg.MODEL.POINT_HEAD.COARSE_PRED_EACH_LAYER
NUM_CLASSES = 1                # hard-coded in the module
NUM_MASK_CLASSES = 1 if CLS_AGNOSTIC_MASK else NUM_CLASSES


def _round_up(x, m):
    return pl.cdiv(x, m) * m


# ------------------------------- kernel ---------------------------------------
def _make_point_head_kernel(num_fc, c_fine, fc_dim, num_mask_classes,
                            coarse_each_layer, bias_col):
    """Fused: num_fc x (conv1d(k=1) + ReLU + coarse fold) + predictor, NCP layout."""

    def kernel(fine_ref, coarse_ref, w_ref, out_ref):
        # fine_ref:   (1, c_fine, TP)               bf16/f32
        # coarse_ref: (1, 1, TP)                    bf16/f32
        # w_ref:      (num_fc+1, rows, w_cols) f32  (resident: constant index_map)
        # out_ref:    (1, num_mask_classes, TP)     f32
        x = fine_ref[0].astype(jnp.float32)          # (c_fine, TP)
        coarse = coarse_ref[0].astype(jnp.float32)   # (1, TP)

        # ---- layer 0: K = c_fine+1 is tiny -> VPU broadcast MACs, skip the MXU ----
        w0 = w_ref[0]
        h = (w0[:fc_dim, c_fine:c_fine + 1] * coarse
             + w0[:fc_dim, bias_col:bias_col + 1])
        for c in range(c_fine):
            h = h + w0[:fc_dim, c:c + 1] * x[c:c + 1, :]
        h = jnp.maximum(h, 0.0)                      # (fc_dim, TP)

        # ---- remaining FC layers: (fc_dim, fc_dim) @ (fc_dim, TP) on the MXU ----
        for k in range(1, num_fc):
            wk = w_ref[k]
            h_new = jnp.dot(wk[:fc_dim, :fc_dim], h,
                            preferred_element_type=jnp.float32)
            if coarse_each_layer:
                h_new = h_new + wk[:fc_dim, fc_dim:fc_dim + 1] * coarse
            h = jnp.maximum(h_new + wk[:fc_dim, bias_col:bias_col + 1], 0.0)

        # ---- predictor ----
        wp = w_ref[num_fc]
        out = jnp.dot(wp[:num_mask_classes, :fc_dim], h,
                      preferred_element_type=jnp.float32)
        if coarse_each_layer:
            out = out + wp[:num_mask_classes, fc_dim:fc_dim + 1] * coarse
        out = out + wp[:num_mask_classes, bias_col:bias_col + 1]
        out_ref[0] = out.astype(out_ref.dtype)       # lane-dense (M, TP) store

    return kernel


# ------------------------------ parameters ------------------------------------
def init_params(key, input_channels):
    """Same shapes/init as the PyTorch module (c2_msra_fill ~ kaiming-normal)."""
    params = []
    fc_dim_in = input_channels + NUM_CLASSES
    for _ in range(NUM_FC):
        key, kw = jax.random.split(key)
        std = (2.0 / fc_dim_in) ** 0.5
        w = jax.random.normal(kw, (FC_DIM, fc_dim_in), jnp.float32) * std
        b = jnp.zeros((FC_DIM,), jnp.float32)
        params.append((w, b))
        fc_dim_in = FC_DIM + (NUM_CLASSES if COARSE_PRED_EACH_LAYER else 0)
    key, kw = jax.random.split(key)
    w_pred = jax.random.normal(kw, (NUM_MASK_CLASSES, fc_dim_in), jnp.float32) * 0.001
    b_pred = jnp.zeros((NUM_MASK_CLASSES,), jnp.float32)
    params.append((w_pred, b_pred))
    return params


def _pack_params(params):
    """Pack every layer's (weight, bias) into ONE zero-padded (L, rows, cols) f32 array.

    Column layout per layer: [0 : c_in-1) fine-feature weights, column c_in-1
    the coarse-feature weight (c_in-1 == C for layer 0, == FC_DIM afterwards),
    last column the bias.  The kernel slices these statically.
    """
    rows = max(FC_DIM, NUM_MASK_CLASSES)
    max_cin = max(w.shape[1] for (w, _) in params)
    w_cols = max_cin + 1                      # + bias column
    bias_col = w_cols - 1
    packed = jnp.zeros((len(params), rows, w_cols), jnp.float32)
    for k, (w, b) in enumerate(params):
        c_out, c_in = w.shape
        packed = packed.at[k, :c_out, :c_in].set(w)
        packed = packed.at[k, :c_out, bias_col].set(b)
    return packed, bias_col


# -------------------------------- wrapper --------------------------------------
def standard_point_head(fine_grained_features, coarse_features, params, *,
                        tile_points=1024, compute_dtype=jnp.bfloat16):
    """fine: (N, C, P), coarse: (N, 1, P)  ->  (N, NUM_MASK_CLASSES, P) in f32."""
    N, C, P = fine_grained_features.shape
    assert coarse_features.shape == (N, NUM_CLASSES, P)

    packed_w, bias_col = _pack_params(params)

    # bf16 for the HBM->VMEM transfer only; all math is f32 inside the kernel.
    fine_in = fine_grained_features.astype(compute_dtype)
    coarse_in = coarse_features.astype(compute_dtype)

    # Lane-aligned point tiles; pad ragged point counts instead of asserting.
    tp = max(128, min(_round_up(tile_points, 128), _round_up(P, 128)))
    p_pad = _round_up(P, tp)
    if p_pad != P:
        pad = ((0, 0), (0, 0), (0, p_pad - P))
        fine_in = jnp.pad(fine_in, pad)
        coarse_in = jnp.pad(coarse_in, pad)

    grid = (N, p_pad // tp)
    kernel = _make_point_head_kernel(NUM_FC, C, FC_DIM, NUM_MASK_CLASSES,
                                     COARSE_PRED_EACH_LAYER, bias_col)

    in_specs = [
        pl.BlockSpec((1, C, tp), lambda n, p: (n, 0, p)),             # fine (lane-dense)
        pl.BlockSpec((1, NUM_CLASSES, tp), lambda n, p: (n, 0, p)),   # coarse
        pl.BlockSpec(packed_w.shape, lambda n, p: (0, 0, 0)),         # weights (resident)
    ]
    out_spec = pl.BlockSpec((1, NUM_MASK_CLASSES, tp), lambda n, p: (n, 0, p))

    act_bytes = fine_in.dtype.itemsize
    hidden_in = FC_DIM + (NUM_CLASSES if COARSE_PRED_EACH_LAYER else 0)
    flops_per_point = (2 * FC_DIM * (C + NUM_CLASSES)
                       + 2 * (NUM_FC - 1) * FC_DIM * hidden_in
                       + 2 * NUM_MASK_CLASSES * hidden_in)
    cost = pl.CostEstimate(
        flops=int(N * p_pad * flops_per_point),
        transcendentals=0,
        bytes_accessed=int(N * p_pad * ((C + NUM_CLASSES) * act_bytes
                                        + NUM_MASK_CLASSES * 4)
                           + packed_w.size * packed_w.dtype.itemsize),
    )

    out = pl.pallas_call(
        kernel,
        out_shape=jax.ShapeDtypeStruct((N, NUM_MASK_CLASSES, p_pad), jnp.float32),
        grid_spec=pltpu.PrefetchScalarGridSpec(
            num_scalar_prefetch=0,
            grid=grid,
            in_specs=in_specs,
            out_specs=out_spec,
        ),
        compiler_params=pltpu.CompilerParams(
            dimension_semantics=("parallel", "parallel")),
        cost_estimate=cost,
    )(fine_in, coarse_in, packed_w)

    return out[:, :, :P]


# ------------------------------- reference -------------------------------------
def standard_point_head_ref(fine, coarse, params):
    """Pure-JAX reference mirroring the PyTorch forward (NCP, concat each layer)."""
    x = jnp.concatenate((fine, coarse), axis=1)
    for k in range(NUM_FC):
        w, b = params[k]
        x = jnp.einsum('oc,ncp->nop', w, x) + b[None, :, None]
        x = jnp.maximum(x, 0.0)
        if COARSE_PRED_EACH_LAYER:
            x = jnp.concatenate((x, coarse), axis=1)
    w, b = params[-1]
    return jnp.einsum('oc,ncp->nop', w, x) + b[None, :, None]


if __name__ == "__main__":
    key = jax.random.PRNGKey(0)
    N, C, P = 2, 4, 1200   # ragged point count: exercises padding + multi-tile grid

    k_fine, k_coarse, k_params = jax.random.split(key, 3)
    fine = jax.random.normal(k_fine, (N, C, P), jnp.float32)
    coarse = jax.random.normal(k_coarse, (N, NUM_CLASSES, P), jnp.float32)
    params = init_params(k_params, input_channels=C)

    out = standard_point_head(fine, coarse, params, tile_points=1024)
    out = jax.block_until_ready(out)
    assert out.shape == (N, NUM_MASK_CLASSES, P), out.shape

    # Strict check: same math as the module applied to the bf16-rounded inputs
    # the kernel actually consumes (verifies the fused kernel itself).
    fine_q = fine.astype(jnp.bfloat16).astype(jnp.float32)
    coarse_q = coarse.astype(jnp.bfloat16).astype(jnp.float32)
    ref_q = standard_point_head_ref(fine_q, coarse_q, params)
    err_q = float(jnp.max(jnp.abs(out - ref_q)))
    assert jnp.allclose(out, ref_q, atol=1e-4, rtol=1e-4), err_q

    # Loose check vs. the exact f32 module output (only bf16 input quantization differs).
    ref = standard_point_head_ref(fine, coarse, params)
    err = float(jnp.max(jnp.abs(out - ref)))
    assert jnp.allclose(out, ref, atol=5e-3, rtol=1e-2), err

    print("KERNEL_OK")
</pallas_src>

<mosaic_0001>
module attributes {stable_mosaic.version = 11 : i64} {
  func.func @kernel(%arg0: i32, %arg1: i32, %arg2: memref<1x4x1024xbf16, #tpu.memory_space<vmem>>, %arg3: memref<1x1x1024xbf16, #tpu.memory_space<vmem>>, %arg4: memref<4x32x34xf32, #tpu.memory_space<vmem>>, %arg5: memref<1x1x1024xf32, #tpu.memory_space<vmem>>) attributes {dimension_semantics = [#tpu.dimension_semantics<parallel>, #tpu.dimension_semantics<parallel>], iteration_bounds = array<i64: 2, 2>, scalar_prefetch = 0 : i64, scratch_operands = 0 : i64, tpu.core_type = #tpu.core_type<tc>, window_params = [{transform_indices = @transform_0, window_bounds = array<i64: 1, 4, 1024>}, {transform_indices = @transform_1, window_bounds = array<i64: 1, 1, 1024>}, {pipeline_mode = #tpu.pipeline_mode<synchronous>, transform_indices = @transform_2, window_bounds = array<i64: 4, 32, 34>}, {transform_indices = @transform_3, window_bounds = array<i64: 1, 1, 1024>}]} {
    %c0 = arith.constant 0 : index
    %c0_0 = arith.constant 0 : index
    %c0_1 = arith.constant 0 : index
    %0 = vector.load %arg2[%c0, %c0_0, %c0_1] : memref<1x4x1024xbf16, #tpu.memory_space<vmem>>, vector<1x4x1024xbf16>
    %1 = vector.shape_cast %0 : vector<1x4x1024xbf16> to vector<4x1024xbf16>
    %2 = arith.extf %1 : vector<4x1024xbf16> to vector<4x1024xf32>
    %c0_2 = arith.constant 0 : index
    %c0_3 = arith.constant 0 : index
    %c0_4 = arith.constant 0 : index
    %3 = vector.load %arg3[%c0_2, %c0_3, %c0_4] : memref<1x1x1024xbf16, #tpu.memory_space<vmem>>, vector<1x1x1024xbf16>
    %4 = vector.shape_cast %3 : vector<1x1x1024xbf16> to vector<1x1024xbf16>
    %5 = arith.extf %4 : vector<1x1024xbf16> to vector<1x1024xf32>
    %c0_5 = arith.constant 0 : index
    %c0_6 = arith.constant 0 : index
    %c0_7 = arith.constant 0 : index
    %6 = vector.load %arg4[%c0_5, %c0_6, %c0_7] : memref<4x32x34xf32, #tpu.memory_space<vmem>>, vector<1x32x34xf32>
    %7 = vector.shape_cast %6 : vector<1x32x34xf32> to vector<32x34xf32>
    %8 = vector.extract_strided_slice %7 {offsets = [0, 4], sizes = [32, 1], strides = [1, 1]} : vector<32x34xf32> to vector<32x1xf32>
    %9 = vector.broadcast %8 : vector<32x1xf32> to vector<32x1024xf32>
    %10 = vector.broadcast %5 : vector<1x1024xf32> to vector<32x1024xf32>
    %11 = arith.mulf %9, %10 : vector<32x1024xf32>
    %12 = vector.extract_strided_slice %7 {offsets = [0, 33], sizes = [32, 1], strides = [1, 1]} : vector<32x34xf32> to vector<32x1xf32>
    %13 = vector.broadcast %12 : vector<32x1xf32> to vector<32x1024xf32>
    %14 = arith.addf %11, %13 : vector<32x1024xf32>
    %15 = vector.extract_strided_slice %7 {offsets = [0, 0], sizes = [32, 1], strides = [1, 1]} : vector<32x34xf32> to vector<32x1xf32>
    %16 = vector.extract_strided_slice %2 {offsets = [0, 0], sizes = [1, 1024], strides = [1, 1]} : vector<4x1024xf32> to vector<1x1024xf32>
    %17 = vector.broadcast %15 : vector<32x1xf32> to vector<32x1024xf32>
    %18 = vector.broadcast %16 : vector<1x1024xf32> to vector<32x1024xf32>
    %19 = arith.mulf %17, %18 : vector<32x1024xf32>
    %20 = arith.addf %14, %19 : vector<32x1024xf32>
    %21 = vector.extract_strided_slice %7 {offsets = [0, 1], sizes = [32, 1], strides = [1, 1]} : vector<32x34xf32> to vector<32x1xf32>
    %22 = vector.extract_strided_slice %2 {offsets = [1, 0], sizes = [1, 1024], strides = [1, 1]} : vector<4x1024xf32> to vector<1x1024xf32>
    %23 = vector.broadcast %21 : vector<32x1xf32> to vector<32x1024xf32>
    %24 = vector.broadcast %22 : vector<1x1024xf32> to vector<32x1024xf32>
    %25 = arith.mulf %23, %24 : vector<32x1024xf32>
    %26 = arith.addf %20, %25 : vector<32x1024xf32>
    %27 = vector.extract_strided_slice %7 {offsets = [0, 2], sizes = [32, 1], strides = [1, 1]} : vector<32x34xf32> to vector<32x1xf32>
    %28 = vector.extract_strided_slice %2 {offsets = [2, 0], sizes = [1, 1024], strides = [1, 1]} : vector<4x1024xf32> to vector<1x1024xf32>
    %29 = vector.broadcast %27 : vector<32x1xf32> to vector<32x1024xf32>
    %30 = vector.broadcast %28 : vector<1x1024xf32> to vector<32x1024xf32>
    %31 = arith.mulf %29, %30 : vector<32x1024xf32>
    %32 = arith.addf %26, %31 : vector<32x1024xf32>
    %33 = vector.extract_strided_slice %7 {offsets = [0, 3], sizes = [32, 1], strides = [1, 1]} : vector<32x34xf32> to vector<32x1xf32>
    %34 = vector.extract_strided_slice %2 {offsets = [3, 0], sizes = [1, 1024], strides = [1, 1]} : vector<4x1024xf32> to vector<1x1024xf32>
    %35 = vector.broadcast %33 : vector<32x1xf32> to vector<32x1024xf32>
    %36 = vector.broadcast %34 : vector<1x1024xf32> to vector<32x1024xf32>
    %37 = arith.mulf %35, %36 : vector<32x1024xf32>
    %38 = arith.addf %32, %37 : vector<32x1024xf32>
    %cst = arith.constant 0.000000e+00 : f32
    %39 = vector.broadcast %cst : f32 to vector<32x1024xf32>
    %40 = arith.maximumf %38, %39 : vector<32x1024xf32>
    %c1 = arith.constant 1 : index
    %c0_8 = arith.constant 0 : index
    %c0_9 = arith.constant 0 : index
    %41 = vector.load %arg4[%c1, %c0_8, %c0_9] : memref<4x32x34xf32, #tpu.memory_space<vmem>>, vector<1x32x34xf32>
    %42 = vector.shape_cast %41 : vector<1x32x34xf32> to vector<32x34xf32>
    %43 = vector.extract_strided_slice %42 {offsets = [0, 0], sizes = [32, 32], strides = [1, 1]} : vector<32x34xf32> to vector<32x32xf32>
    %cst_10 = arith.constant dense<0.000000e+00> : vector<32x1024xf32>
    %44 = tpu.matmul %43, %40, %cst_10 {dimension_numbers = #tpu.dot_dimension_numbers<[1], [0], [0], [1], [0, 0, 1, 1], [], []>} : vector<32x32xf32>, vector<32x1024xf32>, vector<32x1024xf32> -> vector<32x1024xf32>
    %45 = vector.extract_strided_slice %42 {offsets = [0, 32], sizes = [32, 1], strides = [1, 1]} : vector<32x34xf32> to vector<32x1xf32>
    %46 = vector.broadcast %45 : vector<32x1xf32> to vector<32x1024xf32>
    %47 = vector.broadcast %5 : vector<1x1024xf32> to vector<32x1024xf32>
    %48 = arith.mulf %46, %47 : vector<32x1024xf32>
    %49 = arith.addf %44, %48 : vector<32x1024xf32>
    %50 = vector.extract_strided_slice %42 {offsets = [0, 33], sizes = [32, 1], strides = [1, 1]} : vector<32x34xf32> to vector<32x1xf32>
    %51 = vector.broadcast %50 : vector<32x1xf32> to vector<32x1024xf32>
    %52 = arith.addf %49, %51 : vector<32x1024xf32>
    %cst_11 = arith.constant 0.000000e+00 : f32
    %53 = vector.broadcast %cst_11 : f32 to vector<32x1024xf32>
    %54 = arith.maximumf %52, %53 : vector<32x1024xf32>
    %c2 = arith.constant 2 : index
    %c0_12 = arith.constant 0 : index
    %c0_13 = arith.constant 0 : index
    %55 = vector.load %arg4[%c2, %c0_12, %c0_13] : memref<4x32x34xf32, #tpu.memory_space<vmem>>, vector<1x32x34xf32>
    %56 = vector.shape_cast %55 : vector<1x32x34xf32> to vector<32x34xf32>
    %57 = vector.extract_strided_slice %56 {offsets = [0, 0], sizes = [32, 32], strides = [1, 1]} : vector<32x34xf32> to vector<32x32xf32>
    %cst_14 = arith.constant dense<0.000000e+00> : vector<32x1024xf32>
    %58 = tpu.matmul %57, %54, %cst_14 {dimension_numbers = #tpu.dot_dimension_numbers<[1], [0], [0], [1], [0, 0, 1, 1], [], []>} : vector<32x32xf32>, vector<32x1024xf32>, vector<32x1024xf32> -> vector<32x1024xf32>
    %59 = vector.extract_strided_slice %56 {offsets = [0, 32], sizes = [32, 1], strides = [1, 1]} : vector<32x34xf32> to vector<32x1xf32>
    %60 = vector.broadcast %59 : vector<32x1xf32> to vector<32x1024xf32>
    %61 = vector.broadcast %5 : vector<1x1024xf32> to vector<32x1024xf32>
    %62 = arith.mulf %60, %61 : vector<32x1024xf32>
    %63 = arith.addf %58, %62 : vector<32x1024xf32>
    %64 = vector.extract_strided_slice %56 {offsets = [0, 33], sizes = [32, 1], strides = [1, 1]} : vector<32x34xf32> to vector<32x1xf32>
    %65 = vector.broadcast %64 : vector<32x1xf32> to vector<32x1024xf32>
    %66 = arith.addf %63, %65 : vector<32x1024xf32>
    %cst_15 = arith.constant 0.000000e+00 : f32
    %67 = vector.broadcast %cst_15 : f32 to vector<32x1024xf32>
    %68 = arith.maximumf %66, %67 : vector<32x1024xf32>
    %c3 = arith.constant 3 : index
    %c0_16 = arith.constant 0 : index
    %c0_17 = arith.constant 0 : index
    %69 = vector.load %arg4[%c3, %c0_16, %c0_17] : memref<4x32x34xf32, #tpu.memory_space<vmem>>, vector<1x32x34xf32>
    %70 = vector.shape_cast %69 : vector<1x32x34xf32> to vector<32x34xf32>
    %71 = vector.extract_strided_slice %70 {offsets = [0, 0], sizes = [1, 32], strides = [1, 1]} : vector<32x34xf32> to vector<1x32xf32>
    %cst_18 = arith.constant dense<0.000000e+00> : vector<1x1024xf32>
    %72 = tpu.matmul %71, %68, %cst_18 {dimension_numbers = #tpu.dot_dimension_numbers<[1], [0], [0], [1], [0, 0, 1, 1], [], []>} : vector<1x32xf32>, vector<32x1024xf32>, vector<1x1024xf32> -> vector<1x1024xf32>
    %73 = vector.extract_strided_slice %70 {offsets = [0, 32], sizes = [1, 1], strides = [1, 1]} : vector<32x34xf32> to vector<1x1xf32>
    %74 = vector.broadcast %73 : vector<1x1xf32> to vector<1x1024xf32>
    %75 = arith.mulf %74, %5 : vector<1x1024xf32>
    %76 = arith.addf %72, %75 : vector<1x1024xf32>
    %77 = vector.extract_strided_slice %70 {offsets = [0, 33], sizes = [1, 1], strides = [1, 1]} : vector<32x34xf32> to vector<1x1xf32>
    %78 = vector.broadcast %77 : vector<1x1xf32> to vector<1x1024xf32>
    %79 = arith.addf %76, %78 : vector<1x1024xf32>
    %c0_19 = arith.constant 0 : index
    %c0_20 = arith.constant 0 : index
    %c0_21 = arith.constant 0 : index
    %80 = vector.load %arg5[%c0_19, %c0_20, %c0_21] : memref<1x1x1024xf32, #tpu.memory_space<vmem>>, vector<1x1x1024xf32>
    %81 = vector.shape_cast %80 : vector<1x1x1024xf32> to vector<1x1024xf32>
    %82 = vector.shape_cast %79 : vector<1x1024xf32> to vector<1x1x1024xf32>
    tpu.vector_store %arg5[%c0_19, %c0_20, %c0_21], %82 {strides = array<i32>} : memref<1x1x1024xf32, #tpu.memory_space<vmem>>, vector<1x1x1024xf32>,
    return
  }
  func.func @transform_0(%arg0: i32, %arg1: i32) -> (i32, i32, i32) {
    %c0_i32 = arith.constant 0 : i32
    %c0_i32_0 = arith.constant 0 : i32
    return %arg0, %c0_i32, %arg1 : i32, i32, i32
  }
  func.func @transform_1(%arg0: i32, %arg1: i32) -> (i32, i32, i32) {
    %c0_i32 = arith.constant 0 : i32
    %c0_i32_0 = arith.constant 0 : i32
    return %arg0, %c0_i32, %arg1 : i32, i32, i32
  }
  func.func @transform_2(%arg0: i32, %arg1: i32) -> (i32, i32, i32) {
    %c0_i32 = arith.constant 0 : i32
    %c0_i32_0 = arith.constant 0 : i32
    %c0_i32_1 = arith.constant 0 : i32
    %c0_i32_2 = arith.constant 0 : i32
    return %c0_i32, %c0_i32_0, %c0_i32_1 : i32, i32, i32
  }
  func.func @transform_3(%arg0: i32, %arg1: i32) -> (i32, i32, i32) {
    %c0_i32 = arith.constant 0 : i32
    %c0_i32_0 = arith.constant 0 : i32
    return %arg0, %c0_i32, %arg1 : i32, i32, i32
  }
}

</mosaic_0001>

<bundles_post_ra>
// kernel: tpu_custom_call.1
= control target key start
LH: loop header
LB: loop body
LE: loop exit
PB: predicated region body
PF: predicated region fallthrough
CT: control target
= control target key end

     0   :  { %s4437_s0 = inlined_call_operand.hbm [shape: bf16[2,4,2048], index: 0, kind: input, shape index: {}]   ;;  %s4438_s1 = inlined_call_operand.vmem [shape: bf16[2,1,2048], index: 1, kind: input, shape index: {}]   ;;  %s4439_s2 = inlined_call_operand.hbm [shape: f32[4,32,34], index: 2, kind: input, shape index: {}]   ;;  %s4440_s3 = inlined_call_operand.hbm [shape: f32[2,1,2048], index: 3, kind: output, shape index: {}]  }
   0x1   :  { %4533 = sst [smem:[#allocation78_spill]] %s4439_s2 }
   0x2   :  { %8 = vsyncpa [#allocation3], 0 }
   0x3   :  { %10 = vsyncpa [#allocation3 + $0x1], 0 }
   0x4   :  { %11 = vsyncpa [#allocation6], 0 }
   0x5   :  { %12 = vsyncpa [#allocation4], 0 }
   0x6   :  { %14 = vsyncpa [#allocation4 + $0x1], 0  ;;  %s3065_s12 = smov 0   ;;  %s3067_s13 = smov 0  }
   0x7   :  { %s3069_s14 = smov 0   ;;  %s3071_s15 = smov 0  }
   0x8   :  { %s3073_s16 = smov 0   ;;  %s3075_s17 = smov 0  }
   0x9   :  { %s3077_s18 = smov 0   ;;  %s3079_s19 = smov 0  }
   0xa LB: > { %4534 = sst [smem:[#allocation11_spill]] %s3021_s17  ;;  %s2590_s20 = sadd.s32 4294967295, %s3029_s19   ;;  %s3029_s19 = sphi %s3079_s19, %s20_s19   ;;  %s3025_s18 = sphi %s3077_s18, %s4703_s18   ;;  %s3021_s17 = sphi %s3075_s17, %s4697_s17   ;;  %s3017_s16 = sphi %s3073_s16, %s4702_s16   ;;  %s3013_s15 = sphi %s3071_s15, %s4696_s15   ;;  %s3009_s14 = sphi %s3069_s14, %s4701_s14   ;;  %s3005_s13 = sphi %s3067_s13, %s4700_s13   ;;  %s3001_s12 = sphi %s3065_s12, %s4699_s12  }
   0xb   : > { %s2591_s21 = sadd.s32 4294967294, %s3029_s19   ;;  %p54_p0 = scmp.ne.s32.totalorder %s3005_s13, %s3001_s12 }
   0xc   : > { %p3109_p1 = scmp.eq.s32.totalorder %s2590_s20, 0  ;;  %p3113_p2 = scmp.eq.s32.totalorder %s2590_s20, 3 }
   0xd   : > { %p135_p3 = scmp.eq.s32.totalorder %s2591_s21, 3  ;;  %p2592_p5 = scmp.ge.s32.totalorder %s3029_s19, 1 }
   0xe   : > { %s4535_s22 = scalar_select %p3109_p1, 1, 0 }
   0xf   : > { %s4536_s23 = scalar_select %p3113_p2, 1, 0 }
  0x10   : > { %p3119_p4 = por %p3109_p1, %p54_p0  ;;  %p3124_p6 = por %p135_p3, %p54_p0 }
  0x11   : > { %p142_p7 = scmp.lt.s32.totalorder %s3029_s19, 5  ;;  %s3031_s27 = smov [#allocation5]  }
  0x12   : > { %s4537_s24 = scalar_select %p3119_p4, 1, 0 }
  0x13   : > { %s4538_s25 = scalar_select %p3124_p6, 1, 0 }
  0x14   : > { %p3129_p8 = pnand %p2592_p5, %p142_p7  ;;  %s154_s28 = sshll.u32 %s3031_s27, 4  ;;  %s155_s28 = int_to_ptr.vmem [resolvable:$true] %s154_s28 }
  0x15   : > { %4539 = sst [smem:[#allocation12_spill]] %s4538_s25  ;;  %s4542_s2 = sld [smem:[#allocation78_spill]] }
  0x16   : > { %s4540_s26 = scalar_select %p3129_p8, 1, 0 }
  0x17   : > { %p2751_p9 = pneg %p3129_p8 }
  0x19   : > { %p3137_p10 = pnand %p2751_p9, %p3109_p1 }
  0x1b   : > { %s2869_s5 = scalar_lea.hbm %s4542_s2, 2048  ;;  %p2871_p12 = pneg %p3137_p10 }
  0x1c   : > { %p2870_p11 = scmp.ne.s32.totalorder %s4542_s2, %s2869_s5  ;;  %p2876_p3 = scmp.lt.u32.totalorder %s2869_s5, %s4542_s2 }
  0x1e   : > { %p2872_p13 = pnand %p2871_p12, %p2870_p11 }
  0x20   : > { %p2873_p0 = pneg %p2872_p13 }
  0x22   : > { %p2878_p5 = pnand %p2876_p3, %p2873_p0 }
  0x24   : > { %2881 = shalt.err (!%p2878_p5)
}
  0x25   : > { %s2882_s10 = scalar_lea.vmem %s155_s28, 2048  ;;  %p2890_p1 = scmp.lt.s32.totalorder %s155_s28, %s155_s28 }
  0x26   : > { %p2883_p7 = scmp.ne.s32.totalorder %s155_s28, %s2882_s10  ;;  %p2891_p4 = scmp.lt.s32.totalorder %s2882_s10, %s2882_s10 }
  0x28   : > { %p2885_p9 = pnand %p2883_p7, %p2871_p12  ;;  %p2892_p8 = por %p2891_p4, %p2890_p1 }
  0x2a   : > { %p2886_p6 = pneg %p2885_p9 }
  0x2c   : > { %p2893_p2 = pnand %p2892_p8, %p2886_p6 }
  0x2e   : > { %2896 = shalt.err (!%p2893_p2)
}
  0x2f   : > { %s3032_s11 = smov 128   ;;  %s3033_s20 = smov 8  }
  0x30   : > { %2754 = dma.hbm_to_vmem [thread:$0]  (!%p3137_p10), %s4542_s2, 2048, %s155_s28, [#allocation6], %s3032_s11, %s3032_s11, %s3033_s20  }
  0x31   : > { %s29_s30 = sadd.s32 1, %s3021_s17  ;;  %s32_s4 = sadd.s32 1, %s3025_s18 }
  0x32   : > { %p30_p1 = scmp.ge.s32.totalorder %s29_s30, 2  ;;  %s41_s5 = sadd.s32 1, %s3009_s14 }
  0x33   : > { %p48_p2 = scmp.ne.s32.totalorder %s3009_s14, %s3005_s13  ;;  %p49_p4 = scmp.eq.s32.totalorder %s3029_s19, 0 }
  0x34   : > { %s4705_s30 = smov (%p30_p1, %s29_s30), 0  ;;  %s4707_s4 = smov (!%p30_p1, %s32_s4), %s3025_s18 }
  0x35   : > { %4543 = sst [smem:[#allocation13_spill]] %s4705_s30  ;;  %s37_s6 = ssub.s32 %s3021_s17, %s4705_s30 }
  0x36   : > { %p34_p6 = scmp.ge.s32.totalorder %s4707_s4, 2  ;;  %p4544_p8 = scmp.ne.s32.totalorder %s4536_s23, 0 }
  0x37   : > { %p3174_p10 = por %p49_p4, %p48_p2  ;;  %p2764_p12 = scmp.lt.s32.totalorder %s3029_s19, 4 }
  0x38   : > { %p3170_p11 = por %p4544_p8, %p48_p2  ;;  %s4709_s4 = smov (%p34_p6, %s4707_s4), 0 }
  0x39   : > { %4547 = sst [smem:[#allocation14_spill]] %s4709_s4  ;;  %s168_s7 = sand.u32 1, %s3009_s14  }
  0x3a   : > { %s2596_s8 = sshll.u32 %s3021_s17, 3  ;;  %s36_s9 = ssub.s32 %s3025_s18, %s4709_s4 }
  0x3b   : > { %s38_s10 = sor.u32 %s37_s6, %s36_s9  ;;  %s2595_s11 = sshll.u32 %s168_s7, 4 }
  0x3c   : > { %p39_p13 = scmp.eq.s32.totalorder %s38_s10, 0  ;;  %s2597_s23 = sshll.u32 %s3025_s18, 4 }
  0x3d   : > { %s172_s20 = scalar_lea.vmem [#allocation2], %s2595_s11  ;;  %s178_s2 = sadd.s32 %s2597_s23, %s2596_s8 }
  0x3e   : > { %s182_s21 = sshll.u32 %s172_s20, 4  ;;  %s2598_s30 = sshll.u32 %s178_s2, 5  ;;  %s3189_s21 = int_to_ptr.vmem [resolvable:$true] %s182_s21 }
  0x3f   : > { %s3187_s27 = scalar_select %p39_p13, %s3009_s14, %s41_s5  }
  0x40   : > { %p3195_p0 = pnand %p2764_p12, %p3174_p10  ;;  %s3202_s6 = scalar_lea.hbm %s4437_s0, %s2598_s30 }
  0x41   : > { %s169_s5 = scalar_lea.sflag [#allocation3], %s168_s7  ;;  %s2897_s8 = scalar_lea.hbm %s3202_s6, 256 }
  0x42   : > { %p2898_p3 = scmp.ne.s32.totalorder %s3202_s6, %s2897_s8  ;;  %p2899_p5 = pneg %p3195_p0 }
  0x43   : > { %s2902_s17 = scalar_lea.hbm %s4437_s0, 1024  ;;  %p2903_p1 = scmp.lt.u32.totalorder %s3202_s6, %s4437_s0 }
  0x44   : > { %p2900_p7 = pnand %p2899_p5, %p2898_p3  ;;  %p2904_p2 = scmp.lt.u32.totalorder %s2902_s17, %s2897_s8 }
  0x45   : > { %p2906_p6 = scmp.lt.u32.totalorder %s2897_s8, %s3202_s6 }
  0x46   : > { %p2901_p9 = pneg %p2900_p7  ;;  %p2905_p4 = por %p2904_p2, %p2903_p1 }
  0x48   : > { %p2907_p8 = por %p2906_p6, %p2905_p4 }
  0x4a   : > { %p2908_p10 = pnand %p2907_p8, %p2901_p9 }
  0x4c   : > { %2911 = shalt.err (!%p2908_p10)
}
  0x4d   : > { %s2912_s7 = scalar_lea.vmem %s3189_s21, 256  ;;  %s3034_s9 = smov [#allocation2]  }
  0x4e   : > { %p2913_p12 = scmp.ne.s32.totalorder %s3189_s21, %s2912_s7  ;;  %s2917_s10 = sshll.u32 %s3034_s9, 4  ;;  %s2918_s10 = int_to_ptr.vmem [resolvable:$false] %s2917_s10 }
  0x4f   : > { %s2919_s11 = scalar_lea.vmem %s2918_s10, 512  ;;  %p2920_p7 = scmp.lt.s32.totalorder %s3189_s21, %s2918_s10 }
  0x50   : > { %p2915_p13 = pnand %p2913_p12, %p2899_p5  ;;  %p2921_p1 = scmp.lt.s32.totalorder %s2919_s11, %s2912_s7 }
  0x52   : > { %p2916_p3 = pneg %p2915_p13  ;;  %p2922_p2 = por %p2921_p1, %p2920_p7 }
  0x54   : > { %p2923_p4 = pnand %p2922_p2, %p2916_p3 }
  0x56   : > { %2926 = shalt.err (!%p2923_p4)
}
  0x57   : > { %2758 = dma.hbm_to_vmem [thread:$0]  (!%p3195_p0), %s3202_s6, 256, %s3189_s21, %s169_s5  }
  0x58   : > { %p4549_p9 = scmp.ne.s32.totalorder %s4540_s26, 0 }
  0x5a   : > { %203 = sbr.rel (%p4549_p9) target bundleno = 1054 (0x41e), region = 32 }
  0x61   : > { %s3232_s23 = sand.u32 1, %s3005_s13   ;;  %p4550_p5 = scmp.ne.s32.totalorder %s4537_s24, 0 }
  0x62   : > { %s2600_s20 = sshll.u32 %s3232_s23, 4  ;;  %s206_s8 = scalar_lea.sflag [#allocation3], %s3232_s23 }
  0x63   : > { %s3236_s2 = scalar_lea.vmem [#allocation2], %s2600_s20 }
  0x64   : > { %2988 = dma.done.wait (%p4550_p5), %s206_s8, 256  }
  0x65   : > { %2990 = vsyncadd (%p4550_p5), %s206_s8, 4294967040  ;;  %p4551_p0 = scmp.ne.s32.totalorder %s4535_s22, 0 }
  0x67   : > { %2992 = dma.done.wait (%p4551_p0), [#allocation6], 2048  }
  0x68   : > { %2994 = vsyncadd (%p4551_p0), [#allocation6], 4294965248  ;;  %v4451_v0 = vmov 33   ;;  %v3036_v1 = vmov 4   ;;  %v264_v2 = vld [vmem:[#allocation5] sm:$0xff]  ;;  %v265_v3 = vld [vmem:[#allocation5 + $0x8] sm:$0xff]  ;;  %v290_v11 = vlaneseq }
  0x69   : > { %2844 = vset.pattern.permute.xlu1 %v4451_v0  ;;  %2843 = vset.pattern.permute.xlu0 %v3036_v1  ;;  %v267_v4 = vld [vmem:[#allocation5 + $0x18] sm:$0xff]  ;;  %v3037_v5 = vmov 0   ;;  %v266_v6 = vld [vmem:[#allocation5 + $0x10] sm:$0xff]  ;;  %v3038_v7 = vmov 1   ;;  %v3039_v8 = vmov 3   ;;  %v3040_v9 = vmov 2  }
  0x6a   : > { %395 = vperm.xlu1 %2844, %v264_v2   ;;  %270 = vperm.xlu0 %2843, %v264_v2   ;;  %v4449_v10 = vmov 0.0   ;;  %s3252_s22 = sshll.u32 %s3013_s15, 3  ;;  %p246_p6 = scmp.lt.s32.totalorder %s3017_s16, 1  ;;  %v3261_v12 = vshrl.u32 %v290_v11, 7  ;;  %v255_v16 = vld [vmem:[%s3236_s2] sm:$0xff]  ;;  %v256_v21 = vld [vmem:[%s3236_s2 + $0x8] sm:$0xff] }
  0x6b   : > { %1216 = vmatprep.mubr.f32.mxu0 %v4449_v10  ;;  %1305 = vmatprep.mubr.f32.mxu1 %v4449_v10  ;;  %p248_p8 = scmp.lt.s32.totalorder %s3252_s22, 15  ;;  %v3278_v23 = vunpack.c.l.bf16 %v255_v16  ;;  %v3280_v24 = vunpack.c.h.bf16 %v255_v16  ;;  %v3287_v27 = vunpack.c.l.bf16 %v256_v21  ;;  %v3297_v31 = vunpack.c.h.bf16 %v256_v21  ;;  %s2602_s15 = sshll.u32 %s3232_s23, 3 }
  0x6c   : > { %s247_s24 = scalar_select %p246_p6, %s3017_s16, 1  ;;  %4552 = vst [vmem:[#allocation15_spill] sm:$0xff] %v3261_v12  ;;  %v3264_v14 = vsub.s32 0, %v3261_v12  ;;  %v300_v17 = vsub.s32 4, %v3261_v12  ;;  %v3269_v19 = vsub.s32 2, %v3261_v12  ;;  %v3272_v20 = vsub.s32 6, %v3261_v12 }
  0x6d   : > { %s249_s25 = scalar_select %p248_p8, %s3252_s22, 15  ;;  %v620_v35 = vsub.s32 5, %v3261_v12  ;;  %v3325_v42 = vsub.s32 1, %v3261_v12  ;;  %v4453_v11 = vmov 32   ;;  %vm1143_vm0 = vcmask 261120  }
  0x6e   : > { %399 = vperm.xlu1 %2844, %v265_v3   ;;  %275 = vperm.xlu0 %2843, %v265_v3   ;;  %s2604_s26 = sshll.u32 %s247_s24, 4  ;;  %v469_v34 = vrot.slane %v3278_v23, %v300_v17  ;;  %v477_v36 = vrot.slane %v3280_v24, %v300_v17  ;;  %v465_v37 = vrot.slane %v3278_v23, %v3264_v14  ;;  %s2643_s17 = sshll.u32 %s3017_s16, 4 }
  0x6f   : > { %s251_s21 = sadd.s32 %s2604_s26, %s249_s25  ;;  %v473_v38 = vrot.slane %v3280_v24, %v3264_v14  ;;  %v485_v43 = vrot.slane %v3287_v27, %v300_v17  ;;  %v493_v47 = vrot.slane %v3297_v31, %v300_v17  ;;  %v621_v50 = vrot.slane %v3278_v23, %v620_v35  ;;  %s2474_s4 = sadd.s32 %s2643_s17, %s3252_s22 }
  0x70   : > { %s252_s28 = scalar_lea.vmem %s4438_s1, %s251_s21  ;;  %v3346_v49 = vrot.slane %v469_v34, %v3264_v14  ;;  %v481_v51 = vrot.slane %v3287_v27, %v3264_v14  ;;  %v3352_v52 = vrot.slane %v477_v36, %v3264_v14  ;;  %v3355_v53 = vrot.slane %v465_v37, %v3264_v14  ;;  %s2644_s30 = sshll.u32 %s2474_s4, 4 }
  0x71   : > { %v261_v13 = vld [vmem:[%s252_s28] sm:$0xff]  ;;  %v3358_v54 = vrot.slane %v473_v38, %v3264_v14  ;;  %v629_v56 = vrot.slane %v3280_v24, %v620_v35  ;;  %v617_v57 = vrot.slane %v3278_v23, %v3325_v42  ;;  %v625_v58 = vrot.slane %v3280_v24, %v3325_v42  ;;  %s243_s7 = scalar_lea.vmem [#allocation7], %s2602_s15  ;;  %s4383_s20 = scalar_lea.hbm %s4440_s3, %s2644_s30 }
  0x72   : > { %2845 = vset.pattern.permute.xlu1 %v3037_v5  ;;  %285 = vperm.xlu0 %2843, %v267_v4   ;;  %v263_v15 = vunpack.c.h.bf16 %v261_v13  ;;  %v262_v18 = vunpack.c.l.bf16 %v261_v13  ;;  %v3370_v59 = vrot.slane %v485_v43, %v3264_v14  ;;  %v637_v60 = vrot.slane %v3287_v27, %v620_v35  ;;  %s2478_s9 = sshll.u32 %s243_s7, 4  ;;  %s2462_s16 = scalar_lea.sflag [#allocation4], %s3232_s23  ;;  %s4385_s9 = int_to_ptr.vmem [resolvable:$true] %s2478_s9 }
  0x73   : > { %447 = vperm.xlu1 %2845, %v265_v3   ;;  %v3374_v61 = vrot.slane %v493_v47, %v3264_v14  ;;  %v645_v62 = vrot.slane %v3297_v31, %v620_v35  ;;  %v489_v63 = vrot.slane %v3297_v31, %v3264_v14  ;;  %v3402_v13 = vrot.slane %v629_v56, %v3325_v42  ;;  %v3442_v56 = vld [vmem:[#allocation5 + $0x38] sm:$0xff]  ;;  %s2927_s8 = scalar_lea.vmem %s4385_s9, 128  ;;  %s3044_s2 = smov [#allocation7]  }
  0x74   : > { %v3276_v22 = vrot.slane %v263_v15, %v3264_v14  ;;  %v3282_v25 = vrot.slane %v263_v15, %v300_v17  ;;  %v3285_v26 = vrot.slane %v262_v18, %v3264_v14  ;;  %v3290_v28 = vrot.slane %v262_v18, %v3269_v19  ;;  %4569 = vst [vmem:[#allocation32_spill] sm:$0xff] %v3370_v59  ;;  %p2928_p10 = scmp.ne.s32.totalorder %s4385_s9, %s2927_s8  ;;  %s2931_s22 = sshll.u32 %s3044_s2, 4  ;;  %s2932_s22 = int_to_ptr.vmem [resolvable:$false] %s2931_s22 }
  0x75   : > { %v3292_v29 = vrot.slane %v262_v18, %v300_v17  ;;  %v3295_v30 = vrot.slane %v262_v18, %v3272_v20  ;;  %v3304_v33 = vrot.slane %v263_v15, %v3272_v20  ;;  %v3314_v39 = vrot.slane %v263_v15, %v3269_v19  ;;  %4570 = vst [vmem:[#allocation33_spill] sm:$0xff] %v3374_v61  ;;  %s2933_s24 = scalar_lea.vmem %s2932_s22, 256  ;;  %p2934_p3 = scmp.lt.s32.totalorder %s4385_s9, %s2932_s22 }
  0x76   : > { %2848 = vset.pattern.permute.xlu0 %v4451_v0  ;;  %4553 = vst [vmem:[#allocation16_spill] sm:$0xff] %v3276_v22  ;;  %4554 = vst [vmem:[#allocation17_spill] sm:$0xff] %v3282_v25  ;;  %v3301_v32 = vrot.slane %v3276_v22, %v3264_v14  ;;  %v3318_v40 = vrot.slane %v3282_v25, %v3264_v14  ;;  %v3322_v41 = vrot.slane %v3285_v26, %v3264_v14  ;;  %p2929_p12 = pnand %p2928_p10, %p3170_p11  ;;  %p2935_p7 = scmp.lt.s32.totalorder %s2933_s24, %s2927_s8 }
  0x77   : > { %2846 = vset.pattern.permute.xlu1 %v3036_v1  ;;  %403 = vperm.xlu0 %2848, %v266_v6   ;;  %4555 = vst [vmem:[#allocation18_spill] sm:$0xff] %v3285_v26  ;;  %4556 = vst [vmem:[#allocation19_spill] sm:$0xff] %v3290_v28  ;;  %v3330_v44 = vrot.slane %v3290_v28, %v3264_v14  ;;  %v3334_v45 = vrot.slane %v3292_v29, %v3264_v14 }
  0x78   : > { %280 = vperm.xlu1 %2846, %v266_v6   ;;  %4557 = vst [vmem:[#allocation20_spill] sm:$0xff] %v3292_v29  ;;  %4558 = vst [vmem:[#allocation21_spill] sm:$0xff] %v3295_v30  ;;  %v3338_v46 = vrot.slane %v3295_v30, %v3264_v14  ;;  %v3343_v48 = vrot.slane %v3304_v33, %v3264_v14  ;;  %v3362_v55 = vrot.slane %v3314_v39, %v3264_v14  ;;  %p2930_p13 = pneg %p2929_p12  ;;  %p2936_p1 = por %p2935_p7, %p2934_p3 }
  0x79   : > { %4559 = vst [vmem:[#allocation22_spill] sm:$0xff] %v3301_v32  ;;  %4560 = vst [vmem:[#allocation23_spill] sm:$0xff] %v3304_v33  ;;  %v3380_v1 = vrot.slane %v621_v50, %v3325_v42  ;;  %v3405_v15 = vrot.slane %v617_v57, %v3325_v42  ;;  %v3408_v16 = vrot.slane %v625_v58, %v3325_v42 }
  0x7a   : > { %4561 = vst [vmem:[#allocation24_spill] sm:$0xff] %v3314_v39  ;;  %4562 = vst [vmem:[#allocation25_spill] sm:$0xff] %v3318_v40  ;;  %v769_v17 = vrot.slane %v3278_v23, %v3269_v19  ;;  %v3415_v18 = vrot.slane %v637_v60, %v3325_v42  ;;  %v3418_v21 = vrot.slane %v645_v62, %v3325_v42  ;;  %p2937_p2 = pnand %p2936_p1, %p2930_p13 }
  0x7b   : > { %2849 = vset.pattern.permute.xlu0 %v3037_v5  ;;  %4563 = vst [vmem:[#allocation26_spill] sm:$0xff] %v3322_v41  ;;  %4564 = vst [vmem:[#allocation27_spill] sm:$0xff] %v3330_v44  ;;  %v3421_v34 = vrot.slane %v489_v63, %v3264_v14  ;;  %v777_v37 = vrot.slane %v3280_v24, %v3269_v19  ;;  %v641_v38 = vrot.slane %v3297_v31, %v3325_v42 }
  0x7c   : > { %2847 = vset.pattern.permute.xlu1 %v3038_v7  ;;  %443 = vperm.xlu0 %2849, %v264_v2   ;;  %4565 = vst [vmem:[#allocation28_spill] sm:$0xff] %v3334_v45  ;;  %4566 = vst [vmem:[#allocation29_spill] sm:$0xff] %v3338_v46  ;;  %v789_v58 = vrot.slane %v3287_v27, %v3272_v20  ;;  %v797_v60 = vrot.slane %v3297_v31, %v3272_v20 }
  0x7d   : > { %599 = vperm.xlu1 %2847, %v264_v2   ;;  %4567 = vst [vmem:[#allocation30_spill] sm:$0xff] %v3343_v48  ;;  %4568 = vst [vmem:[#allocation31_spill] sm:$0xff] %v3362_v55  ;;  %v793_v10 = vrot.slane %v3297_v31, %v3269_v19 }
  0x7e   : > { %4574 = vst [vmem:[#allocation37_spill] sm:$0xff] %v3415_v18  ;;  %4575 = vst [vmem:[#allocation38_spill] sm:$0xff] %v3418_v21 }
  0x7f   : > { %4576 = vst [vmem:[#allocation39_spill] sm:$0xff] %v3421_v34  ;;  %4581 = vst [vmem:[#allocation44_spill] sm:$0xff] %v3442_v56 }
  0x80   : > { %455 = vperm.xlu0 %2849, %v267_v4  }
  0x81   : > { %603 = vperm.xlu1 %2847, %v265_v3  }
  0x84   : > { %2853 = vset.pattern.permute.xlu0 %v3038_v7 }
  0x85   : > { %2850 = vset.pattern.permute.xlu1 %v4451_v0  ;;  %607 = vperm.xlu0 %2853, %v266_v6  }
  0x86   : > { %407 = vperm.xlu1 %2850, %v267_v4  }
  0x89   : > { %2856 = vset.pattern.permute.xlu0 %v3039_v8 }
  0x8a   : > { %2851 = vset.pattern.permute.xlu1 %v3037_v5  ;;  %907 = vperm.xlu0 %2856, %v265_v3   ;;  %v3389_v5 = vsub.s32 3, %v3261_v12 }
  0x8b   : > { %451 = vperm.xlu1 %2851, %v266_v6  }
  0x8c   : > { %v929_v57 = vrot.slane %v3280_v24, %v3389_v5 }
  0x8e   : > { %911 = vperm.xlu0 %2856, %v266_v6  }
  0x8f   : > { %2852 = vset.pattern.permute.xlu1 %v3040_v9 }
  0x90   : > { %751 = vperm.xlu1 %2852, %v264_v2  }
  0x92   : > { %2859 = vset.pattern.permute.xlu0 %v4453_v11 }
  0x94   : > { %755 = vperm.xlu1 %2852, %v265_v3   ;;  %v3384_v3 = vrot.slane %v481_v51, %v3264_v14  ;;  %v921_v14 = vrot.slane %v3278_v23, %v3389_v5  ;;  %v3440_v51 = vld [vmem:[#allocation5 + $0x30] sm:$0xff] }
  0x95   : > { %4580 = vst [vmem:[#allocation43_spill] sm:$0xff] %v3440_v51 }
  0x96   : > { %4571 = vst [vmem:[#allocation34_spill] sm:$0xff] %v3384_v3 }
  0x98   : > { %2854 = vset.pattern.permute.xlu1 %v3038_v7  ;;  %v3393_v7 = vld [vmem:[#allocation5 + $0x20] sm:$0xff] }
  0x99   : > { %611 = vperm.xlu1 %2854, %v267_v4   ;;  %4572 = vst [vmem:[#allocation35_spill] sm:$0xff] %v3393_v7  ;;  %1093 = vperm.xlu0 %2859, %v3393_v7  }
  0x9d   : > { %2855 = vset.pattern.permute.xlu1 %v3039_v8  ;;  %1108 = vperm.xlu0 %2859, %v3442_v56  }
  0x9e   : > { %903 = vperm.xlu1 %2855, %v264_v2   ;;  %v924_v2 = vsub.s32 7, %v3261_v12 }
  0xa0   : > { %v925_v35 = vrot.slane %v3278_v23, %v924_v2  ;;  %v933_v36 = vrot.slane %v3280_v24, %v924_v2  ;;  %v941_v62 = vrot.slane %v3287_v27, %v924_v2  ;;  %v949_v63 = vrot.slane %v3297_v31, %v924_v2 }
  0xa1   : > { %v937_v2 = vrot.slane %v3287_v27, %v3389_v5  ;;  %2862 = vset.pattern.permute.xlu0 %v4451_v0 }
  0xa2   : > { %2857 = vset.pattern.permute.xlu1 %v3040_v9  ;;  %v3397_v9 = vld [vmem:[#allocation5 + $0x28] sm:$0xff] }
  0xa3   : > { %759 = vperm.xlu1 %2857, %v266_v6   ;;  %v781_v6 = vrot.slane %v3280_v24, %v3272_v20  ;;  %4573 = vst [vmem:[#allocation36_spill] sm:$0xff] %v3397_v9  ;;  %v785_v24 = vrot.slane %v3287_v27, %v3269_v19  ;;  %1513 = vperm.xlu0 %2862, %v3397_v9  }
  0xa5   : > { %v3433_v47 = vrot.slane %v781_v6, %v3269_v19  ;;  %v3463_v6 = vrot.slane %v933_v36, %v3389_v5  ;;  %v3481_v36 = vrot.slane %v929_v57, %v3389_v5  ;;  %v3498_v57 = vrot.slane %v785_v24, %v3269_v19 }
  0xa6   : > { %v3511_v24 = vrot.slane %v793_v10, %v3269_v19 }
  0xa7   : > { %763 = vperm.xlu1 %2857, %v267_v4   ;;  %4578 = vst [vmem:[#allocation41_spill] sm:$0xff] %v3433_v47  ;;  %4589 = vst [vmem:[#allocation52_spill] sm:$0xff] %v3498_v57 }
  0xa8   : > { %4591 = vst [vmem:[#allocation54_spill] sm:$0xff] %v3511_v24 }
  0xab   : > { %2858 = vset.pattern.permute.xlu1 %v3039_v8  ;;  %v633_v8 = vrot.slane %v3287_v27, %v3325_v42 }
  0xac   : > { %915 = vperm.xlu1 %2858, %v267_v4   ;;  %v773_v4 = vrot.slane %v3278_v23, %v3272_v20  ;;  %v3453_v23 = vrot.slane %v769_v17, %v3269_v19  ;;  %v3466_v20 = vrot.slane %v777_v37, %v3269_v19  ;;  %v3472_v17 = vrot.slane %v921_v14, %v3389_v5 }
  0xad   : > { %v3438_v50 = vrot.slane %v633_v8, %v3325_v42  ;;  %v3469_v8 = vrot.slane %v641_v38, %v3325_v42  ;;  %v3484_v37 = vrot.slane %v789_v58, %v3269_v19  ;;  %v3487_v42 = vrot.slane %v797_v60, %v3269_v19 }
  0xae   : > { %v3430_v43 = vrot.slane %v773_v4, %v3269_v19  ;;  %4582 = vst [vmem:[#allocation45_spill] sm:$0xff] %v3453_v23  ;;  %v3460_v4 = vrot.slane %v925_v35, %v3389_v5  ;;  %4583 = vst [vmem:[#allocation46_spill] sm:$0xff] %v3466_v20  ;;  %v945_v35 = vrot.slane %v3297_v31, %v3389_v5 }
  0xaf   : > { %4579 = vst [vmem:[#allocation42_spill] sm:$0xff] %v3438_v50  ;;  %4584 = vst [vmem:[#allocation47_spill] sm:$0xff] %v3469_v8  ;;  %v3492_v14 = vrot.slane %v941_v62, %v3389_v5  ;;  %v3495_v31 = vrot.slane %v949_v63, %v3389_v5  ;;  %v3508_v63 = vrot.slane %v937_v2, %v3389_v5 }
  0xb0   : > { %2860 = vset.pattern.permute.xlu1 %v4453_v11  ;;  %4577 = vst [vmem:[#allocation40_spill] sm:$0xff] %v3430_v43  ;;  %4585 = vst [vmem:[#allocation48_spill] sm:$0xff] %v3484_v37  ;;  %v3514_v33 = vrot.slane %v945_v35, %v3389_v5 }
  0xb1   : > { %1098 = vperm.xlu1 %2860, %v3397_v9   ;;  %4586 = vst [vmem:[#allocation49_spill] sm:$0xff] %v3487_v42  ;;  %4587 = vst [vmem:[#allocation50_spill] sm:$0xff] %v3492_v14 }
  0xb2   : > { %4588 = vst [vmem:[#allocation51_spill] sm:$0xff] %v3495_v31  ;;  %4590 = vst [vmem:[#allocation53_spill] sm:$0xff] %v3508_v63 }
  0xb3   : > { %4592 = vst [vmem:[#allocation55_spill] sm:$0xff] %v3514_v33 }
  0xb5   : > { %1103 = vperm.xlu1 %2860, %v3440_v51  }
  0xb9   : > { %2861 = vset.pattern.permute.xlu1 %v4451_v0 }
  0xba   : > { %1509 = vperm.xlu1 %2861, %v3393_v7  }
  0xbe   : > { %1517 = vperm.xlu1 %2861, %v3440_v51  }
  0xc2   : > { %1521 = vperm.xlu1 %2861, %v3442_v56  }
  0xe9   : > { %v396_v27 = vpop.permute.xlu1 %395  ;;  %v271_v38 = vpop.permute.xlu0 %270 }
  0xea   : > { %v366_v58 = vmul.f32 %v3301_v32, %v271_v38  ;;  %v368_v60 = vmul.f32 %v3318_v40, %v271_v38  ;;  %v363_v0 = vmul.f32 %v3330_v44, %v271_v38  ;;  %v365_v11 = vmul.f32 %v3338_v46, %v271_v38 }
  0xeb   : > { %v362_v62 = vmul.f32 %v3322_v41, %v271_v38  ;;  %v364_v39 = vmul.f32 %v3334_v45, %v271_v38  ;;  %v367_v22 = vmul.f32 %v3362_v55, %v271_v38  ;;  %v369_v12 = vmul.f32 %v3343_v48, %v271_v38 }
  0xec   : > { %v3516_v25 = vadd.f32 %v396_v27, %v363_v0  ;;  %v3521_v29 = vadd.f32 %v396_v27, %v365_v11  ;;  %v3525_v26 = vadd.f32 %v396_v27, %v366_v58  ;;  %v3527_v10 = vadd.f32 %v396_v27, %v368_v60 }
  0xed   : > { %v400_v30 = vpop.permute.xlu1 %399  ;;  %v276_v28 = vpop.permute.xlu0 %275  ;;  %v3523_v2 = vadd.f32 %v396_v27, %v362_v62  ;;  %v4595_v38 = vmov 32   ;;  %v3539_v51 = vadd.f32 %v396_v27, %v364_v39  ;;  %v3541_v7 = vadd.f32 %v396_v27, %v367_v22 }
  0xee   : > { %4593 = vst [vmem:[#allocation56_spill] sm:$0xff] %v3525_v26  ;;  %4594 = vst [vmem:[#allocation57_spill] sm:$0xff] %v3527_v10  ;;  %v374_v0 = vmul.f32 %v3301_v32, %v276_v28  ;;  %v376_v19 = vmul.f32 %v3318_v40, %v276_v28  ;;  %v371_v5 = vmul.f32 %v3330_v44, %v276_v28  ;;  %2863 = vset.pattern.permute.xlu0 %v4595_v38 }
  0xef   : > { %v373_v35 = vmul.f32 %v3338_v46, %v276_v28  ;;  %v370_v11 = vmul.f32 %v3322_v41, %v276_v28  ;;  %v372_v62 = vmul.f32 %v3334_v45, %v276_v28  ;;  %v375_v58 = vmul.f32 %v3362_v55, %v276_v28  ;;  %2864 = vset.pattern.permute.xlu1 %v4595_v38 }
  0xf0   : > { %v377_v60 = vmul.f32 %v3343_v48, %v276_v28  ;;  %v419_v9 = vadd.f32 %v400_v30, %v371_v5  ;;  %v3543_v33 = vadd.f32 %v396_v27, %v369_v12  ;;  %v422_v63 = vadd.f32 %v400_v30, %v374_v0 }
  0xf1   : > { %v286_v24 = vpop.permute.xlu0 %285  ;;  %v421_v8 = vadd.f32 %v400_v30, %v373_v35  ;;  %v418_v10 = vadd.f32 %v400_v30, %v370_v11  ;;  %v424_v57 = vadd.f32 %v400_v30, %v376_v19  ;;  %v420_v20 = vadd.f32 %v400_v30, %v372_v62 }
  0xf2   : > { %v448_v42 = vpop.permute.xlu1 %447  ;;  %v3547_v37 = vmul.f32 %v3301_v32, %v286_v24  ;;  %v423_v28 = vadd.f32 %v400_v30, %v375_v58  ;;  %v425_v5 = vadd.f32 %v400_v30, %v377_v60  ;;  %v3554_v0 = vmul.f32 %v3318_v40, %v286_v24 }
  0xf3   : > { %v543_v39 = vmul.f32 %v3346_v49, %v448_v42  ;;  %v545_v22 = vmul.f32 %v3352_v52, %v448_v42  ;;  %v542_v12 = vmul.f32 %v3355_v53, %v448_v42  ;;  %v544_v27 = vmul.f32 %v3358_v54, %v448_v42 }
  0xf4   : > { %4596 = vst [vmem:[#allocation58_spill] sm:$0xff] %v3547_v37  ;;  %4597 = vst [vmem:[#allocation59_spill] sm:$0xff] %v3554_v0  ;;  %v3557_v19 = vmul.f32 %v3330_v44, %v286_v24  ;;  %v547_v35 = vmul.f32 %v3370_v59, %v448_v42  ;;  %v549_v11 = vmul.f32 %v3374_v61, %v448_v42 }
  0xf5   : > { %v3561_v62 = vadd.f32 %v543_v39, %v419_v9  ;;  %v3564_v30 = vmul.f32 %v3338_v46, %v286_v24  ;;  %v3567_v58 = vmul.f32 %v3322_v41, %v286_v24  ;;  %v3570_v60 = vmul.f32 %v3334_v45, %v286_v24 }
  0xf6   : > { %v3573_v56 = vpop.permute.xlu0 %403  ;;  %v577_v0 = vadd.f32 %v545_v22, %v421_v8  ;;  %v574_v37 = vadd.f32 %v542_v12, %v418_v10  ;;  %v546_v23 = vmul.f32 %v3384_v3, %v448_v42  ;;  %v548_v9 = vmul.f32 %v3421_v34, %v448_v42 }
  0xf7   : > { %4598 = vst [vmem:[#allocation60_spill] sm:$0xff] %v3573_v56  ;;  %v281_v39 = vpop.permute.xlu1 %280  ;;  %v576_v47 = vadd.f32 %v544_v27, %v420_v20  ;;  %v3577_v43 = vadd.f32 %v547_v35, %v423_v28  ;;  %v3579_v26 = vadd.f32 %v549_v11, %v425_v5  ;;  %v3582_v31 = vmul.f32 %v3362_v55, %v286_v24 }
  0xf8   : > { %v382_v14 = vmul.f32 %v3301_v32, %v281_v39  ;;  %v379_v38 = vmul.f32 %v3330_v44, %v281_v39  ;;  %v381_v8 = vmul.f32 %v3338_v46, %v281_v39  ;;  %v3588_v10 = vmul.f32 %v3343_v48, %v286_v24 }
  0xf9   : > { %4599 = vst [vmem:[#allocation61_spill] sm:$0xff] %v3582_v31  ;;  %v384_v42 = vmul.f32 %v3318_v40, %v281_v39  ;;  %v378_v20 = vmul.f32 %v3322_v41, %v281_v39  ;;  %v380_v28 = vmul.f32 %v3334_v45, %v281_v39  ;;  %v3593_v5 = vadd.f32 %v546_v23, %v422_v63 }
  0xfa   : > { %4600 = vst [vmem:[#allocation62_spill] sm:$0xff] %v3588_v10  ;;  %v3596_v22 = vadd.f32 %v3573_v56, %v379_v38  ;;  %v3599_v12 = vadd.f32 %v3573_v56, %v381_v8  ;;  %v3601_v27 = vadd.f32 %v548_v9, %v424_v57  ;;  %v3604_v35 = vmul.f32 %v3362_v55, %v281_v39 }
  0xfb   : > { %v3606_v24 = vpop.permute.xlu0 %443  ;;  %v3609_v11 = vadd.f32 %v3573_v56, %v378_v20  ;;  %v3612_v40 = vadd.f32 %v3573_v56, %v380_v28  ;;  %v3615_v23 = vmul.f32 %v3343_v48, %v281_v39  ;;  %v3618_v63 = vadd.f32 %v3573_v56, %v382_v14 }
  0xfc   : > { %4601 = vst [vmem:[#allocation63_spill] sm:$0xff] %v3601_v27  ;;  %4602 = vst [vmem:[#allocation64_spill] sm:$0xff] %v3604_v35  ;;  %v3620_v38 = vpop.permute.xlu1 %599  ;;  %v535_v57 = vmul.f32 %v3346_v49, %v3606_v24  ;;  %v537_v9 = vmul.f32 %v3352_v52, %v3606_v24  ;;  %v534_v8 = vmul.f32 %v3355_v53, %v3606_v24  ;;  %v4623_v35 = vld [vmem:[#allocation45_spill] sm:$0xff] }
  0xfd   : > { %4603 = vst [vmem:[#allocation65_spill] sm:$0xff] %v3615_v23  ;;  %4604 = vst [vmem:[#allocation66_spill] sm:$0xff] %v3618_v63  ;;  %v536_v20 = vmul.f32 %v3358_v54, %v3606_v24  ;;  %v687_v39 = vmul.f32 %v3380_v1, %v3620_v38  ;;  %v689_v14 = vmul.f32 %v3402_v13, %v3620_v38 }
  0xfe   : > { %v686_v28 = vmul.f32 %v3405_v15, %v3620_v38  ;;  %v688_v48 = vmul.f32 %v3408_v16, %v3620_v38  ;;  %v567_v55 = vadd.f32 %v535_v57, %v3516_v25  ;;  %v569_v32 = vadd.f32 %v537_v9, %v3521_v29 }
  0xff   : > { %v566_v46 = vadd.f32 %v534_v8, %v3523_v2  ;;  %v568_v44 = vadd.f32 %v536_v20, %v3539_v51  ;;  %v3642_v45 = vpop.permute.xlu0 %455  ;;  %v539_v41 = vmul.f32 %v3370_v59, %v3606_v24  ;;  %v691_v63 = vmul.f32 %v3415_v18, %v3620_v38 }
 0x100   : > { %4605 = vst [vmem:[#allocation67_spill] sm:$0xff] %v3642_v45  ;;  %v541_v10 = vmul.f32 %v3374_v61, %v3606_v24  ;;  %v3651_v23 = vadd.f32 %v3573_v56, %v384_v42  ;;  %v3653_v25 = vpop.permute.xlu1 %603  ;;  %v3655_v29 = vadd.f32 %v687_v39, %v567_v55  ;;  %v3657_v2 = vadd.f32 %v689_v14, %v569_v32 }
 0x101   : > { %v3659_v51 = vadd.f32 %v686_v28, %v566_v46  ;;  %v693_v57 = vmul.f32 %v3418_v21, %v3620_v38  ;;  %v695_v9 = vmul.f32 %v3380_v1, %v3653_v25  ;;  %v697_v8 = vmul.f32 %v3402_v13, %v3653_v25 }
 0x102   : > { %4606 = vst [vmem:[#allocation68_spill] sm:$0xff] %v3651_v23  ;;  %v694_v42 = vmul.f32 %v3405_v15, %v3653_v25  ;;  %v696_v55 = vmul.f32 %v3408_v16, %v3653_v25  ;;  %v3671_v20 = vadd.f32 %v688_v48, %v568_v44  ;;  %v559_v32 = vmul.f32 %v3346_v49, %v3642_v45 }
 0x103   : > { %v561_v46 = vmul.f32 %v3352_v52, %v3642_v45  ;;  %v558_v39 = vmul.f32 %v3355_v53, %v3642_v45  ;;  %v3680_v14 = vadd.f32 %v695_v9, %v3561_v62  ;;  %v3682_v28 = vadd.f32 %v697_v8, %v577_v0 }
 0x104   : > { %v3684_v23 = vadd.f32 %v694_v42, %v574_v37  ;;  %v560_v44 = vmul.f32 %v3358_v54, %v3642_v45  ;;  %v3688_v48 = vpop.permute.xlu0 %607  ;;  %v571_v61 = vadd.f32 %v539_v41, %v3541_v7  ;;  %v699_v59 = vmul.f32 %v3415_v18, %v3653_v25 }
 0x105   : > { %4607 = vst [vmem:[#allocation69_spill] sm:$0xff] %v3688_v48  ;;  %v573_v31 = vadd.f32 %v541_v10, %v3543_v33  ;;  %v701_v62 = vmul.f32 %v3418_v21, %v3653_v25  ;;  %v3696_v9 = vpop.permute.xlu1 %407  ;;  %v3698_v0 = vadd.f32 %v696_v55, %v576_v47  ;;  %v703_v37 = vmul.f32 %v3380_v1, %v3688_v48 }
 0x106   : > { %4608 = vst [vmem:[#allocation70_spill] sm:$0xff] %v3696_v9  ;;  %v705_v8 = vmul.f32 %v3402_v13, %v3688_v48  ;;  %v702_v41 = vmul.f32 %v3405_v15, %v3688_v48  ;;  %v435_v7 = vadd.f32 %v3696_v9, %v3557_v19  ;;  %v437_v33 = vadd.f32 %v3696_v9, %v3564_v30 }
 0x107   : > { %v434_v10 = vadd.f32 %v3696_v9, %v3567_v58  ;;  %v436_v47 = vadd.f32 %v3696_v9, %v3570_v60  ;;  %v704_v42 = vmul.f32 %v3408_v16, %v3688_v48  ;;  %v723_v55 = vadd.f32 %v691_v63, %v571_v61 }
 0x108   : > { %v3717_v21 = vadd.f32 %v699_v59, %v3577_v43  ;;  %v725_v18 = vadd.f32 %v693_v57, %v573_v31  ;;  %v3719_v45 = vadd.f32 %v559_v32, %v435_v7  ;;  %v3721_v19 = vadd.f32 %v561_v46, %v437_v33  ;;  %v4610_v33 = vld [vmem:[#allocation50_spill] sm:$0xff] }
 0x109   : > { %v3723_v56 = vadd.f32 %v558_v39, %v434_v10  ;;  %v3726_v30 = vadd.f32 %v701_v62, %v3579_v26  ;;  %v3728_v58 = vpop.permute.xlu0 %907  ;;  %v3730_v60 = vadd.f32 %v560_v44, %v436_v47  ;;  %v538_v61 = vmul.f32 %v3384_v3, %v3606_v24 }
 0x10a   : > { %v690_v59 = vmul.f32 %v3438_v50, %v3620_v38  ;;  %v698_v43 = vmul.f32 %v3438_v50, %v3653_v25  ;;  %v3738_v31 = vpop.permute.xlu1 %451  ;;  %v999_v63 = vmul.f32 %v3460_v4, %v3728_v58  ;;  %v1001_v26 = vmul.f32 %v3463_v6, %v3728_v58 }
 0x10b   : > { %4609 = vst [vmem:[#allocation71_spill] sm:$0xff] %v3738_v31  ;;  %v998_v57 = vmul.f32 %v3472_v17, %v3728_v58  ;;  %v540_v32 = vmul.f32 %v3421_v34, %v3606_v24  ;;  %v551_v46 = vmul.f32 %v3346_v49, %v3738_v31  ;;  %v553_v39 = vmul.f32 %v3352_v52, %v3738_v31  ;;  %v4611_v24 = vld [vmem:[#allocation51_spill] sm:$0xff]  ;;  %v4612_v49 = vld [vmem:[#allocation56_spill] sm:$0xff] }
 0x10c   : > { %v550_v44 = vmul.f32 %v3355_v53, %v3738_v31  ;;  %v552_v62 = vmul.f32 %v3358_v54, %v3738_v31  ;;  %v1000_v7 = vmul.f32 %v3481_v36, %v3728_v58  ;;  %v3760_v10 = vmul.f32 %v4610_v33, %v3728_v58 }
 0x10d   : > { %v3764_v47 = vmul.f32 %v4611_v24, %v3728_v58  ;;  %v570_v34 = vadd.f32 %v538_v61, %v4612_v49  ;;  %v3767_v52 = vpop.permute.xlu0 %911  ;;  %v583_v53 = vadd.f32 %v551_v46, %v3596_v22  ;;  %v585_v50 = vadd.f32 %v553_v39, %v3599_v12  ;;  %v4622_v49 = vld [vmem:[#allocation41_spill] sm:$0xff] }
 0x10e   : > { %4613 = vst [vmem:[#allocation50_spill] sm:$0xff] %v3767_v52  ;;  %v582_v54 = vadd.f32 %v550_v44, %v3609_v11  ;;  %v584_v3 = vadd.f32 %v552_v62, %v3612_v40  ;;  %v3775_v48 = vmul.f32 %v3460_v4, %v3767_v52  ;;  %v3779_v31 = vmul.f32 %v3463_v6, %v3767_v52  ;;  %v4621_v44 = vld [vmem:[#allocation40_spill] sm:$0xff] }
 0x10f   : > { %v3783_v61 = vmul.f32 %v3472_v17, %v3767_v52  ;;  %v730_v22 = vadd.f32 %v698_v43, %v3593_v5  ;;  %v752_v46 = vpop.permute.xlu1 %751  ;;  %v3786_v12 = vadd.f32 %v703_v37, %v583_v53  ;;  %v3788_v11 = vadd.f32 %v705_v8, %v585_v50  ;;  %v4626_v37 = vld [vmem:[#allocation48_spill] sm:$0xff]  ;;  %v4627_v50 = vld [vmem:[#allocation49_spill] sm:$0xff] }
 0x110   : > { %4614 = vst [vmem:[#allocation56_spill] sm:$0xff] %v3775_v48  ;;  %4615 = vst [vmem:[#allocation72_spill] sm:$0xff] %v3779_v31  ;;  %v3790_v40 = vadd.f32 %v702_v41, %v582_v54  ;;  %v3794_v39 = vmul.f32 %v3481_v36, %v3767_v52  ;;  %v839_v62 = vmul.f32 %v4621_v44, %v752_v46 }
 0x111   : > { %4616 = vst [vmem:[#allocation73_spill] sm:$0xff] %v3783_v61  ;;  %4617 = vst [vmem:[#allocation74_spill] sm:$0xff] %v3786_v12  ;;  %v841_v9 = vmul.f32 %v4622_v49, %v752_v46  ;;  %v838_v31 = vmul.f32 %v4623_v35, %v752_v46  ;;  %v4624_v61 = vld [vmem:[#allocation46_spill] sm:$0xff]  ;;  %v3800_v5 = vadd.f32 %v704_v42, %v584_v3  ;;  %v4629_v3 = vld [vmem:[#allocation53_spill] sm:$0xff] }
 0x112   : > { %4618 = vst [vmem:[#allocation75_spill] sm:$0xff] %v3788_v11  ;;  %4619 = vst [vmem:[#allocation76_spill] sm:$0xff] %v3790_v40  ;;  %v840_v48 = vmul.f32 %v4624_v61, %v752_v46  ;;  %v843_v43 = vmul.f32 %v4626_v37, %v752_v46  ;;  %v845_v8 = vmul.f32 %v4627_v50, %v752_v46 }
 0x113   : > { %4620 = vst [vmem:[#allocation77_spill] sm:$0xff] %v3794_v39  ;;  %4625 = vst [vmem:[#allocation40_spill] sm:$0xff] %v3800_v5  ;;  %v722_v41 = vadd.f32 %v690_v59, %v570_v34  ;;  %v871_v53 = vadd.f32 %v839_v62, %v3655_v29  ;;  %v873_v54 = vadd.f32 %v841_v9, %v3657_v2  ;;  %v4628_v39 = vld [vmem:[#allocation52_spill] sm:$0xff]  ;;  %v756_v40 = vpop.permute.xlu1 %755 }
 0x114   : > { %v870_v52 = vadd.f32 %v838_v31, %v3659_v51  ;;  %v842_v27 = vmul.f32 %v4628_v39, %v752_v46  ;;  %v872_v11 = vadd.f32 %v840_v48, %v3671_v20  ;;  %v875_v12 = vadd.f32 %v843_v43, %v723_v55  ;;  %v4630_v20 = vld [vmem:[#allocation57_spill] sm:$0xff] }
 0x115   : > { %v877_v24 = vadd.f32 %v845_v8, %v725_v18  ;;  %v1002_v42 = vmul.f32 %v4629_v3, %v3728_v58  ;;  %v847_v5 = vmul.f32 %v4621_v44, %v756_v40  ;;  %v849_v34 = vmul.f32 %v4622_v49, %v756_v40 }
 0x116   : > { %v846_v29 = vmul.f32 %v4623_v35, %v756_v40  ;;  %v848_v2 = vmul.f32 %v4624_v61, %v756_v40  ;;  %v851_v51 = vmul.f32 %v4626_v37, %v756_v40  ;;  %v853_v9 = vmul.f32 %v4627_v50, %v756_v40  ;;  %v4631_v37 = vld [vmem:[#allocation47_spill] sm:$0xff] }
 0x117   : > { %v850_v59 = vmul.f32 %v4628_v39, %v756_v40  ;;  %v572_v48 = vadd.f32 %v540_v32, %v4630_v20  ;;  %v879_v18 = vadd.f32 %v847_v5, %v3680_v14  ;;  %v881_v55 = vadd.f32 %v849_v34, %v3682_v28 }
 0x118   : > { %v878_v31 = vadd.f32 %v846_v29, %v3684_v23  ;;  %v880_v62 = vadd.f32 %v848_v2, %v3698_v0  ;;  %v883_v43 = vadd.f32 %v851_v51, %v3717_v21  ;;  %v885_v8 = vadd.f32 %v853_v9, %v3726_v30  ;;  %v3827_v35 = vpop.permute.xlu1 %611 }
 0x119   : > { %v882_v61 = vadd.f32 %v850_v59, %v730_v22  ;;  %v692_v50 = vmul.f32 %v4631_v37, %v3620_v38  ;;  %v1031_v39 = vadd.f32 %v999_v63, %v879_v18  ;;  %v1033_v32 = vadd.f32 %v1001_v26, %v881_v55 }
 0x11a   : > { %v1030_v20 = vadd.f32 %v998_v57, %v878_v31  ;;  %v1032_v14 = vadd.f32 %v1000_v7, %v880_v62  ;;  %v711_v28 = vmul.f32 %v3380_v1, %v3827_v35  ;;  %v713_v23 = vmul.f32 %v3402_v13, %v3827_v35 }
 0x11b   : > { %v710_v21 = vmul.f32 %v3405_v15, %v3827_v35  ;;  %v712_v0 = vmul.f32 %v3408_v16, %v3827_v35  ;;  %v1063_v30 = vmax.f32 %v1031_v39, 0.0  ;;  %v1065_v38 = vmax.f32 %v1033_v32, 0.0 }
 0x11c   : > { %v1062_v22 = vmax.f32 %v1030_v20, 0.0  ;;  %v874_v5 = vadd.f32 %v842_v27, %v722_v41  ;;  %v1064_v63 = vmax.f32 %v1032_v14, 0.0  ;;  %v743_v26 = vadd.f32 %v711_v28, %v3719_v45 }
 0x11d   : > { %v3839_v57 = vadd.f32 %v713_v23, %v3721_v19  ;;  %v3842_v1 = vadd.f32 %v710_v21, %v3723_v56  ;;  %v3845_v13 = vadd.f32 %v712_v0, %v3730_v60  ;;  %v3848_v15 = vadd.f32 %v3760_v10, %v883_v43  ;;  %v3855_v27 = vpop.permute.xlu1 %903  ;;  %v4632_v56 = vld [vmem:[#allocation54_spill] sm:$0xff]  ;;  %v4638_v0 = vld [vmem:[#allocation75_spill] sm:$0xff] }
 0x11e   : > { %v3851_v16 = vadd.f32 %v3764_v47, %v885_v8  ;;  %v3853_v7 = vadd.f32 %v1002_v42, %v882_v61  ;;  %v700_v45 = vmul.f32 %v4631_v37, %v3653_v25  ;;  %v3859_v19 = vadd.f32 %v692_v50, %v572_v48  ;;  %v4634_v42 = vld [vmem:[#allocation55_spill] sm:$0xff]  ;;  %v4637_v23 = vld [vmem:[#allocation74_spill] sm:$0xff] }
 0x11f   : > { %v3862_v39 = vmul.f32 %v4632_v56, %v752_v46  ;;  %v3865_v60 = vmul.f32 %v4632_v56, %v756_v40  ;;  %v991_v10 = vmul.f32 %v3460_v4, %v3855_v27  ;;  %v993_v47 = vmul.f32 %v3463_v6, %v3855_v27  ;;  %v4633_v40 = vld [vmem:[#allocation51_spill] sm:$0xff] }
 0x120   : > { %v990_v61 = vmul.f32 %v3472_v17, %v3855_v27  ;;  %v992_v25 = vmul.f32 %v3481_v36, %v3855_v27  ;;  %v995_v50 = vmul.f32 %v4610_v33, %v3855_v27  ;;  %v1067_v46 = vmax.f32 %v3848_v15, 0.0 }
 0x121   : > { %v997_v41 = vmul.f32 %v4633_v40, %v3855_v27  ;;  %v3882_v34 = vmul.f32 %v4634_v42, %v3728_v58  ;;  %v1023_v29 = vadd.f32 %v991_v10, %v871_v53  ;;  %v1025_v2 = vadd.f32 %v993_v47, %v873_v54  ;;  %v4640_v47 = vld [vmem:[#allocation40_spill] sm:$0xff] }
 0x122   : > { %v1022_v51 = vadd.f32 %v990_v61, %v870_v52  ;;  %v1024_v9 = vadd.f32 %v992_v25, %v872_v11  ;;  %v1027_v59 = vadd.f32 %v995_v50, %v875_v12  ;;  %v1069_v18 = vmax.f32 %v3851_v16, 0.0  ;;  %v3887_v31 = vpop.permute.xlu1 %759  ;;  %v4635_v12 = vld [vmem:[#allocation45_spill] sm:$0xff]  ;;  %v4636_v11 = vld [vmem:[#allocation46_spill] sm:$0xff]  ;;  %v4639_v16 = vld [vmem:[#allocation76_spill] sm:$0xff] }
 0x123   : > { %v1029_v48 = vadd.f32 %v997_v41, %v877_v24  ;;  %v994_v55 = vmul.f32 %v4629_v3, %v3855_v27  ;;  %v1055_v62 = vmax.f32 %v1023_v29, 0.0  ;;  %v1057_v43 = vmax.f32 %v1025_v2, 0.0 }
 0x124   : > { %v1054_v8 = vmax.f32 %v1022_v51, 0.0  ;;  %v1056_v32 = vmax.f32 %v1024_v9, 0.0  ;;  %v855_v58 = vmul.f32 %v4621_v44, %v3887_v31  ;;  %v857_v52 = vmul.f32 %v4622_v49, %v3887_v31 }
 0x125   : > { %v854_v24 = vmul.f32 %v4635_v12, %v3887_v31  ;;  %v856_v53 = vmul.f32 %v4636_v11, %v3887_v31  ;;  %v2647_v54 = vpack.c.bf16 %v1063_v30, %v1055_v62  ;;  %v2655_v20 = vpack.c.bf16 %v1065_v38, %v1057_v43  ;;  %v4641_v30 = vld [vmem:[#allocation63_spill] sm:$0xff]  ;;  %v4643_v62 = vld [vmem:[#allocation72_spill] sm:$0xff] }
 0x126   : > { %v2649_v14 = vpack.c.bf16 %v1062_v22, %v1054_v8  ;;  %v2657_v28 = vpack.c.bf16 %v1064_v63, %v1056_v32  ;;  %v887_v21 = vadd.f32 %v855_v58, %v4637_v23  ;;  %v889_v15 = vadd.f32 %v857_v52, %v4638_v0  ;;  %v3901_v25 = vpop.permute.xlu1 %763  ;;  %v4642_v63 = vld [vmem:[#allocation56_spill] sm:$0xff]  ;;  %v4645_v32 = vld [vmem:[#allocation77_spill] sm:$0xff] }
 0x127   : > { %v886_v10 = vadd.f32 %v854_v24, %v4639_v16  ;;  %v888_v61 = vadd.f32 %v856_v53, %v4640_v47  ;;  %2648 = vmatprep.subr.bf16.mxu0 %v2647_v54  ;;  %2656 = vmatprep.subr.bf16.mxu1 %v2655_v20  ;;  %v1059_v50 = vmax.f32 %v1027_v59, 0.0  ;;  %v1026_v41 = vadd.f32 %v994_v55, %v874_v5  ;;  %v4644_v59 = vld [vmem:[#allocation73_spill] sm:$0xff]  ;;  %v4647_v16 = vld [vmem:[#allocation60_spill] sm:$0xff]  ;;  %v4649_v47 = vld [vmem:[#allocation70_spill] sm:$0xff] }
 0x128   : > { %v1066_v29 = vmax.f32 %v3853_v7, 0.0  ;;  %v732_v38 = vadd.f32 %v700_v45, %v4641_v30  ;;  %2650 = vmatpush1.bf16.msra.mxu0 %v2649_v14  ;;  %2658 = vmatpush1.bf16.msra.mxu1 %v2657_v28  ;;  %v863_v22 = vmul.f32 %v4621_v44, %v3901_v25  ;;  %v1039_v2 = vadd.f32 %v4642_v63, %v887_v21  ;;  %v4651_v30 = vld [vmem:[#allocation32_spill] sm:$0xff] }
 0x129   : > { %v865_v51 = vmul.f32 %v4622_v49, %v3901_v25  ;;  %v1061_v9 = vmax.f32 %v1029_v48, 0.0  ;;  %v1041_v43 = vadd.f32 %v4643_v62, %v889_v15  ;;  %v862_v5 = vmul.f32 %v4635_v12, %v3901_v25 }
 0x12a   : > { %v1038_v7 = vadd.f32 %v4644_v59, %v886_v10  ;;  %v864_v45 = vmul.f32 %v4636_v11, %v3901_v25  ;;  %v895_v55 = vadd.f32 %v863_v22, %v743_v26  ;;  %v1071_v8 = vmax.f32 %v1039_v2, 0.0  ;;  %v4652_v22 = vld [vmem:[#allocation67_spill] sm:$0xff]  ;;  %v4653_v59 = vld [vmem:[#allocation69_spill] sm:$0xff] }
 0x12b   : > { %v897_v44 = vadd.f32 %v865_v51, %v3839_v57  ;;  %v1040_v58 = vadd.f32 %v4645_v32, %v888_v61  ;;  %v1073_v52 = vmax.f32 %v1041_v43, 0.0  ;;  %v894_v49 = vadd.f32 %v862_v5, %v3842_v1  ;;  %v3920_v53 = vpop.permute.xlu1 %915 }
 0x12c   : > { %v1070_v48 = vmax.f32 %v1038_v7, 0.0  ;;  %v896_v24 = vadd.f32 %v864_v45, %v3845_v13  ;;  %v2663_v54 = vpack.c.bf16 %v1067_v46, %v1059_v50  ;;  %v2671_v20 = vpack.c.bf16 %v1069_v18, %v1061_v9  ;;  %v4654_v7 = vld [vmem:[#allocation37_spill] sm:$0xff] }
 0x12d   : > { %v1072_v12 = vmax.f32 %v1040_v58, 0.0  ;;  %v1058_v14 = vmax.f32 %v1026_v41, 0.0  ;;  %v1015_v26 = vmul.f32 %v3460_v4, %v3920_v53  ;;  %v1017_v57 = vmul.f32 %v3463_v6, %v3920_v53 }
 0x12e   : > { %v1014_v11 = vmul.f32 %v3472_v17, %v3920_v53  ;;  %v1016_v1 = vmul.f32 %v3481_v36, %v3920_v53  ;;  %v876_v13 = vadd.f32 %v3862_v39, %v3859_v19  ;;  %v884_v46 = vadd.f32 %v3865_v60, %v732_v38  ;;  %v4646_v17 = vld [vmem:[#allocation64_spill] sm:$0xff]  ;;  %v4648_v36 = vld [vmem:[#allocation61_spill] sm:$0xff] }
 0x12f   : > { %v2665_v28 = vpack.c.bf16 %v1066_v29, %v1058_v14  ;;  %v996_v18 = vmul.f32 %v4634_v42, %v3855_v27  ;;  %v1047_v23 = vadd.f32 %v1015_v26, %v895_v55  ;;  %v1049_v4 = vadd.f32 %v1017_v57, %v897_v44  ;;  %v4650_v27 = vld [vmem:[#allocation71_spill] sm:$0xff]  ;;  %v4655_v44 = vld [vmem:[#allocation48_spill] sm:$0xff]  ;;  %v4658_v26 = vld [vmem:[#allocation62_spill] sm:$0xff] }
 0x130   : > { %v1046_v21 = vadd.f32 %v1014_v11, %v894_v49  ;;  %v1048_v0 = vadd.f32 %v1016_v1, %v896_v24  ;;  %v1036_v15 = vadd.f32 %v3882_v34, %v884_v46  ;;  %v431_v10 = vadd.f32 %v4647_v16, %v4646_v17  ;;  %v4659_v1 = vld [vmem:[#allocation33_spill] sm:$0xff] }
 0x131   : > { %v1028_v6 = vadd.f32 %v996_v18, %v876_v13  ;;  %v439_v61 = vadd.f32 %v4649_v47, %v4648_v36  ;;  %v1079_v50 = vmax.f32 %v1047_v23, 0.0  ;;  %v1081_v19 = vmax.f32 %v1049_v4, 0.0  ;;  %v4660_v18 = vld [vmem:[#allocation38_spill] sm:$0xff]  ;;  %v4662_v4 = vld [vmem:[#allocation49_spill] sm:$0xff] }
 0x132   : > { %v1078_v39 = vmax.f32 %v1046_v21, 0.0  ;;  %v1080_v60 = vmax.f32 %v1048_v0, 0.0  ;;  %v1068_v29 = vmax.f32 %v1036_v15, 0.0  ;;  %v555_v38 = vmul.f32 %v4651_v30, %v4650_v27 }
 0x133   : > { %v1060_v41 = vmax.f32 %v1028_v6, 0.0  ;;  %v563_v63 = vmul.f32 %v4651_v30, %v4652_v22  ;;  %v2651_v2 = vpack.c.bf16 %v1079_v50, %v1071_v8  ;;  %v2659_v34 = vpack.c.bf16 %v1081_v19, %v1073_v52  ;;  %v4656_v52 = vld [vmem:[#allocation50_spill] sm:$0xff] }
 0x134   : > { %v2653_v51 = vpack.c.bf16 %v1078_v39, %v1070_v48  ;;  %v2661_v9 = vpack.c.bf16 %v1080_v60, %v1072_v12  ;;  %v587_v43 = vadd.f32 %v555_v38, %v431_v10  ;;  %v707_v45 = vmul.f32 %v4654_v7, %v4653_v59  ;;  %v4657_v12 = vld [vmem:[#allocation65_spill] sm:$0xff]  ;;  %v4666_v30 = vld [vmem:[#allocation34_spill] sm:$0xff] }
 0x135   : > { %v2673_v62 = vpack.c.bf16 %v1068_v29, %v1060_v41  ;;  %v595_v5 = vadd.f32 %v563_v63, %v439_v61  ;;  %2652 = vmatprep.subr.bf16.mxu0 %v2651_v2  ;;  %2660 = vmatprep.subr.bf16.mxu1 %v2659_v34  ;;  %v715_v55 = vmul.f32 %v4654_v7, %v3827_v35  ;;  %v4663_v61 = vmov 0.0   ;;  %v4665_v29 = vld [vmem:[#allocation36_spill] sm:$0xff]  ;;  %v4667_v63 = vld [vmem:[#allocation42_spill] sm:$0xff] }
 0x136   : > { %v859_v32 = vmul.f32 %v4655_v44, %v3887_v31  ;;  %v867_v8 = vmul.f32 %v4655_v44, %v3901_v25  ;;  %2654 = vmatpush1.bf16.msra.mxu0 %v2653_v51  ;;  %2662 = vmatpush1.bf16.msra.mxu1 %v2661_v9  ;;  %v739_v58 = vadd.f32 %v707_v45, %v587_v43  ;;  %v4669_v7 = vld [vmem:[#allocation66_spill] sm:$0xff] }
 0x137   : > { %v1011_v49 = vmul.f32 %v4610_v33, %v4656_v52  ;;  %v1019_v48 = vmul.f32 %v4610_v33, %v3920_v53  ;;  %2664 = vmatprep.subr.bf16.mxu0 %v2663_v54  ;;  %2672 = vmatprep.subr.bf16.mxu1 %v2671_v20  ;;  %v747_v24 = vadd.f32 %v715_v55, %v595_v5  ;;  %v4661_v33 = vld [vmem:[#allocation35_spill] sm:$0xff] }
 0x138   : > { %v433_v14 = vadd.f32 %v4647_v16, %v4657_v12  ;;  %v441_v57 = vadd.f32 %v4649_v47, %v4658_v26  ;;  %v891_v11 = vadd.f32 %v859_v32, %v739_v58  ;;  %v557_v13 = vmul.f32 %v4659_v1, %v4650_v27  ;;  %v4670_v12 = vld [vmem:[#allocation59_spill] sm:$0xff] }
 0x139   : > { %v565_v46 = vmul.f32 %v4659_v1, %v4652_v22  ;;  %v709_v23 = vmul.f32 %v4660_v18, %v4653_v59  ;;  %2605 = vmatmul.mubr.msk.f32.vlgmr.msra.gmra.mrb[0].mxu0 %vm1143_vm0, %v4661_v33  ;;  %2609 = vmatmul.mubr.msk.f32.vlgmr.msra.gmra.mrb[0].mxu1 %vm1143_vm0, %v4661_v33  ;;  %v899_v54 = vadd.f32 %v867_v8, %v747_v24  ;;  %v4671_v26 = vld [vmem:[#allocation39_spill] sm:$0xff] }
 0x13a   : > { %v717_v20 = vmul.f32 %v4660_v18, %v3827_v35  ;;  %v861_v21 = vmul.f32 %v4662_v4, %v3887_v31  ;;  %2666 = vmatpush1.bf16.msra.mxu0 %v2665_v28  ;;  %2674 = vmatpush1.bf16.msra.mxu1 %v2673_v62  ;;  %v1043_v0 = vadd.f32 %v1011_v49, %v891_v11  ;;  %v4664_v28 = vld [vmem:[#allocation58_spill] sm:$0xff]  ;;  %v4668_v62 = vld [vmem:[#allocation52_spill] sm:$0xff]  ;;  %v4672_v18 = vld [vmem:[#allocation43_spill] sm:$0xff] }
 0x13b   : > { %v589_v6 = vadd.f32 %v557_v13, %v433_v14  ;;  %v597_v15 = vadd.f32 %v565_v46, %v441_v57  ;;  %v1051_v17 = vadd.f32 %v1019_v48, %v899_v54  ;;  %v869_v16 = vmul.f32 %v4662_v4, %v3901_v25  ;;  %1222 = vmatprep.mubr.f32.mxu0 %v4663_v61 }
 0x13c   : > { %v1013_v10 = vmul.f32 %v4633_v40, %v4656_v52  ;;  %v1021_v36 = vmul.f32 %v4633_v40, %v3920_v53  ;;  %v1075_v50 = vmax.f32 %v1043_v0, 0.0  ;;  %1311 = vmatprep.mubr.f32.mxu1 %v4663_v61  ;;  %v438_v60 = vadd.f32 %v4649_v47, %v4664_v28  ;;  %v4071_v28 = vld [vmem:[#allocation5 + $0x50] sm:$0xff] }
 0x13d   : > { %v741_v19 = vadd.f32 %v709_v23, %v589_v6  ;;  %v749_v39 = vadd.f32 %v717_v20, %v597_v15  ;;  %v1083_v41 = vmax.f32 %v1051_v17, 0.0  ;;  %2606 = vmatmul.mubr.msk.f32.gmra.mrb[2].mxu0 %vm1143_vm0, %v4665_v29  ;;  %2610 = vmatmul.mubr.msk.f32.gmra.mrb[2].mxu1 %vm1143_vm0, %v4665_v29  ;;  %v554_v40 = vmul.f32 %v4666_v30, %v4650_v27  ;;  %v4674_v17 = vld [vmem:[#allocation44_spill] sm:$0xff] }
 0x13e   : > { %v562_v38 = vmul.f32 %v4666_v30, %v4652_v22  ;;  %v706_v2 = vmul.f32 %v4667_v63, %v4653_v59  ;;  %v714_v9 = vmul.f32 %v4667_v63, %v3827_v35  ;;  %v858_v43 = vmul.f32 %v4668_v62, %v3887_v31  ;;  %1228 = vmatprep.mubr.f32.mxu0 %v4663_v61  ;;  %v4086_v30 = vpop.permute.xlu1 %1098 }
 0x13f   : > { %v893_v34 = vadd.f32 %v861_v21, %v741_v19  ;;  %v901_v51 = vadd.f32 %v869_v16, %v749_v39  ;;  %v2667_v5 = vpack.c.bf16 %v1083_v41, %v1075_v50  ;;  %v586_v45 = vadd.f32 %v554_v40, %v4669_v7  ;;  %1317 = vmatprep.mubr.f32.mxu1 %v4663_v61  ;;  %v4065_v19 = vld [vmem:[#allocation5 + $0x48] sm:$0xff]  ;;  %v4067_v39 = vld [vmem:[#allocation5 + $0x58] sm:$0xff]  ;;  %v4088_v40 = vpop.permute.xlu0 %1093 }
 0x140   : > { %v594_v55 = vadd.f32 %v562_v38, %v438_v60  ;;  %v866_v44 = vmul.f32 %v4668_v62, %v3901_v25  ;;  %v1010_v58 = vmul.f32 %v4629_v3, %v4656_v52  ;;  %v1018_v49 = vmul.f32 %v4629_v3, %v3920_v53  ;;  %1600 = vperm.xlu1 %2864, %v4065_v19   ;;  %v4679_v62 = vld [vmem:[#allocation27_spill] sm:$0xff] }
 0x141   : > { %v1045_v32 = vadd.f32 %v1013_v10, %v893_v34  ;;  %v1053_v8 = vadd.f32 %v1021_v36, %v901_v51  ;;  %2668 = vmatprep.subr.bf16.mxu0 %v2667_v5  ;;  %v738_v48 = vadd.f32 %v706_v2, %v586_v45  ;;  %v440_v14 = vadd.f32 %v4649_v47, %v4670_v12  ;;  %v4673_v47 = vld [vmem:[#allocation68_spill] sm:$0xff]  ;;  %v4677_v2 = vld [vmem:[#allocation26_spill] sm:$0xff]  ;;  %v4680_v5 = vld [vmem:[#allocation29_spill] sm:$0xff] }
 0x142   : > { %v746_v24 = vadd.f32 %v714_v9, %v594_v55  ;;  %v556_v57 = vmul.f32 %v4671_v26, %v4650_v27  ;;  %v564_v13 = vmul.f32 %v4671_v26, %v4652_v22  ;;  %v708_v46 = vmul.f32 %v4631_v37, %v4653_v59  ;;  %2607 = vmatmul.mubr.msk.f32.gmra.mrb[4].mxu0 %vm1143_vm0, %v4672_v18  ;;  %v4090_v38 = vpop.permute.xlu1 %1103  ;;  %v4678_v51 = vld [vmem:[#allocation28_spill] sm:$0xff] }
 0x143   : > { %v1077_v11 = vmax.f32 %v1045_v32, 0.0  ;;  %v1085_v1 = vmax.f32 %v1053_v8, 0.0  ;;  %2611 = vmatmul.mubr.msk.f32.gmra.mrb[4].mxu1 %vm1143_vm0, %v4672_v18  ;;  %v890_v3 = vadd.f32 %v858_v43, %v738_v48  ;;  %v716_v27 = vmul.f32 %v4631_v37, %v3827_v35  ;;  %1234 = vmatprep.mubr.f32.mxu0 %v4663_v61  ;;  %v4092_v63 = vpop.permute.xlu0 %1108 }
 0x144   : > { %v898_v23 = vadd.f32 %v866_v44, %v746_v24  ;;  %v588_v54 = vadd.f32 %v556_v57, %v4673_v47  ;;  %v596_v22 = vadd.f32 %v564_v13, %v440_v14  ;;  %v860_v59 = vmul.f32 %v4632_v56, %v3887_v31  ;;  %1323 = vmatprep.mubr.f32.mxu1 %v4663_v61 }
 0x145   : > { %v2675_v20 = vpack.c.bf16 %v1085_v1, %v1077_v11  ;;  %v868_v4 = vmul.f32 %v4632_v56, %v3901_v25  ;;  %v1042_v21 = vadd.f32 %v1010_v58, %v890_v3  ;;  %v1012_v15 = vmul.f32 %v4634_v42, %v4656_v52  ;;  %1605 = vperm.xlu1 %2864, %v4071_v28  }
 0x146   : > { %v1050_v0 = vadd.f32 %v1018_v49, %v898_v23  ;;  %v740_v6 = vadd.f32 %v708_v46, %v588_v54  ;;  %v748_v35 = vadd.f32 %v716_v27, %v596_v22  ;;  %v1020_v37 = vmul.f32 %v4634_v42, %v3920_v53  ;;  %2608 = vmatmul.mubr.msk.f32.gmra.mrb[6].mxu0 %vm1143_vm0, %v4674_v17  ;;  %v4102_v49 = vpop.permute.xlu1 %1509 }
 0x147   : > { %2676 = vmatprep.subr.bf16.mxu1 %v2675_v20  ;;  %v1074_v31 = vmax.f32 %v1042_v21, 0.0  ;;  %2612 = vmatmul.mubr.msk.f32.gmra.mrb[6].mxu1 %vm1143_vm0, %v4674_v17  ;;  %v4675_v60 = vmov 33   ;;  %v4676_v41 = vmov 32   ;;  %v1111_v34 = vmul.f32 %v4088_v40, %v4677_v2  ;;  %v4108_v26 = vpop.permute.xlu0 %1513 }
 0x148   : > { %v1082_v16 = vmax.f32 %v1050_v0, 0.0  ;;  %v892_v10 = vadd.f32 %v860_v59, %v740_v6  ;;  %1394 = vmatprep.mubr.f32.mxu0 %v4663_v61  ;;  %v900_v56 = vadd.f32 %v868_v4, %v748_v35  ;;  %1483 = vmatprep.mubr.f32.mxu1 %v4663_v61  ;;  %v1113_v9 = vmul.f32 %v4088_v40, %v4678_v51 }
 0x149   : > { %2865 = vset.pattern.permute.xlu1 %v4675_v60  ;;  %v1112_v43 = vmul.f32 %v4088_v40, %v4679_v62  ;;  %v1114_v7 = vmul.f32 %v4088_v40, %v4680_v5  ;;  %v1119_v12 = vmul.f32 %v4086_v30, %v4677_v2  ;;  %v1121_v14 = vmul.f32 %v4086_v30, %v4678_v51 }
 0x14a   : > { %v2669_v25 = vpack.c.bf16 %v1082_v16, %v1074_v31  ;;  %v1044_v52 = vadd.f32 %v1012_v15, %v892_v10  ;;  %v1052_v36 = vadd.f32 %v1020_v37, %v900_v56  ;;  %v1120_v46 = vmul.f32 %v4086_v30, %v4679_v62  ;;  %v4128_v31 = vpop.permute.xlu1 %1517 }
 0x14b   : > { %v1127_v4 = vmul.f32 %v4090_v38, %v4677_v2  ;;  %v1129_v21 = vmul.f32 %v4090_v38, %v4678_v51  ;;  %v1128_v0 = vmul.f32 %v4090_v38, %v4679_v62  ;;  %v1130_v6 = vmul.f32 %v4090_v38, %v4680_v5 }
 0x14c   : > { %2670 = vmatpush1.bf16.msra.mxu0 %v2669_v25  ;;  %v1076_v50 = vmax.f32 %v1044_v52, 0.0  ;;  %v1084_v42 = vmax.f32 %v1052_v36, 0.0 }
 0x14e   : > { %v2677_v53 = vpack.c.bf16 %v1084_v42, %v1076_v50 }
 0x14f   : > { %2613 = vmatmul.mubr.msk.f32.vlgmr.msra.gmra.mrb[8].mxu0 %vm1143_vm0, %v4661_v33 }
 0x150   : > { %1400 = vmatprep.mubr.f32.mxu0 %v4663_v61  ;;  %2678 = vmatpush1.bf16.msra.mxu1 %v2677_v53 }
 0x153   : > { %2614 = vmatmul.mubr.msk.f32.gmra.mrb[10].mxu0 %vm1143_vm0, %v4665_v29  ;;  %2617 = vmatmul.mubr.msk.f32.vlgmr.msra.gmra.mrb[8].mxu1 %vm1143_vm0, %v4661_v33  ;;  %v4062_v33 = vld [vmem:[#allocation5 + $0x40] sm:$0xff] }
 0x154   : > { %1406 = vmatprep.mubr.f32.mxu0 %v4663_v61  ;;  %1489 = vmatprep.mubr.f32.mxu1 %v4663_v61 }
 0x155   : > { %1595 = vperm.xlu0 %2863, %v4062_v33   ;;  %2010 = vperm.xlu1 %2865, %v4062_v33  }
 0x157   : > { %2615 = vmatmul.mubr.msk.f32.gmra.mrb[12].mxu0 %vm1143_vm0, %v4672_v18  ;;  %2618 = vmatmul.mubr.msk.f32.gmra.mrb[10].mxu1 %vm1143_vm0, %v4665_v29  ;;  %v4081_v29 = vld [vmem:[#allocation5 + $0x60] sm:$0xff] }
 0x158   : > { %1412 = vmatprep.mubr.f32.mxu0 %v4663_v61  ;;  %1495 = vmatprep.mubr.f32.mxu1 %v4663_v61 }
 0x159   : > { %1610 = vperm.xlu0 %2863, %v4067_v39   ;;  %2018 = vperm.xlu1 %2865, %v4071_v28  }
 0x15b   : > { %2616 = vmatmul.mubr.msk.f32.gmra.mrb[14].mxu0 %vm1143_vm0, %v4674_v17  ;;  %2619 = vmatmul.mubr.msk.f32.gmra.mrb[12].mxu1 %vm1143_vm0, %v4672_v18  ;;  %v1122_v18 = vmul.f32 %v4086_v30, %v4680_v5 }
 0x15c   : > { %1717 = vmatprep.mubr.f32.mxu0 %v4663_v61  ;;  %1501 = vmatprep.mubr.f32.mxu1 %v4663_v61 }
 0x15d   : > { %2866 = vset.pattern.permute.xlu0 %v4675_v60  ;;  %2022 = vperm.xlu1 %2865, %v4067_v39  }
 0x15e   : > { %2014 = vperm.xlu0 %2866, %v4065_v19  }
 0x15f   : > { %2620 = vmatmul.mubr.msk.f32.gmra.mrb[14].mxu1 %vm1143_vm0, %v4674_v17 }
 0x160   : > { %1806 = vmatprep.mubr.f32.mxu1 %v4663_v61 }
 0x161   : > { %2391 = vperm.xlu1 %2865, %v4081_v29  }
 0x162   : > { %2867 = vset.pattern.permute.xlu0 %v4676_v41 }
 0x163   : > { %2093 = vperm.xlu0 %2867, %v4081_v29  }
 0x167   : > { %2868 = vset.pattern.permute.xlu0 %v4675_v60 }
 0x20c   : > { %v1218_v45 = vpop.f32.mrb[0].mxu0  ;;  %v1307_v55 = vpop.f32.mrb[0].mxu1 }
 0x20d   : > { %v1219_v44 = vadd.f32 %v1218_v45, %v1111_v34  ;;  %v1308_v32 = vadd.f32 %v1307_v55, %v1113_v9  ;;  %v1220_v8 = vpop.f32.mrb[1].mxu0  ;;  %v1309_v58 = vpop.f32.mrb[1].mxu1 }
 0x20e   : > { %v1221_v48 = vadd.f32 %v1220_v8, %v1112_v43  ;;  %v1310_v24 = vadd.f32 %v1309_v58, %v1114_v7 }
 0x20f   : > { %v1524_v57 = vadd.f32 %v4102_v49, %v1219_v44  ;;  %v1526_v11 = vadd.f32 %v4102_v49, %v1308_v32  ;;  %v1135_v32 = vmul.f32 %v4092_v63, %v4677_v2 }
 0x210   : > { %v1224_v1 = vpop.f32.mrb[2].mxu0  ;;  %v1313_v13 = vpop.f32.mrb[2].mxu1  ;;  %v1525_v3 = vadd.f32 %v4102_v49, %v1221_v48  ;;  %v1527_v23 = vadd.f32 %v4102_v49, %v1310_v24  ;;  %v1137_v24 = vmul.f32 %v4092_v63, %v4678_v51 }
 0x211   : > { %v1225_v47 = vadd.f32 %v1224_v1, %v1119_v12  ;;  %v1314_v54 = vadd.f32 %v1313_v13, %v1121_v14  ;;  %v1226_v27 = vpop.f32.mrb[3].mxu0  ;;  %v1315_v20 = vpop.f32.mrb[3].mxu1  ;;  %v1556_v37 = vmax.f32 %v1524_v57, 0.0  ;;  %v1558_v17 = vmax.f32 %v1526_v11, 0.0 }
 0x212   : > { %v1227_v22 = vadd.f32 %v1226_v27, %v1120_v46  ;;  %v1316_v59 = vadd.f32 %v1315_v20, %v1122_v18  ;;  %v1557_v56 = vmax.f32 %v1525_v3, 0.0  ;;  %v1559_v25 = vmax.f32 %v1527_v23, 0.0  ;;  %v4142_v18 = vpop.permute.xlu1 %1521 }
 0x213   : > { %v1532_v15 = vadd.f32 %v4108_v26, %v1225_v47  ;;  %v1534_v35 = vadd.f32 %v4108_v26, %v1314_v54  ;;  %v1136_v12 = vmul.f32 %v4092_v63, %v4679_v62  ;;  %v1138_v14 = vmul.f32 %v4092_v63, %v4680_v5 }
 0x214   : > { %v1533_v16 = vadd.f32 %v4108_v26, %v1227_v22  ;;  %v1535_v10 = vadd.f32 %v4108_v26, %v1316_v59 }
 0x215   : > { %v1230_v52 = vpop.f32.mrb[4].mxu0  ;;  %v1564_v50 = vmax.f32 %v1532_v15, 0.0  ;;  %v1566_v42 = vmax.f32 %v1534_v35, 0.0 }
 0x216   : > { %v1319_v36 = vpop.f32.mrb[4].mxu1  ;;  %v1231_v53 = vadd.f32 %v1230_v52, %v1127_v4  ;;  %v1232_v41 = vpop.f32.mrb[5].mxu0  ;;  %v1565_v9 = vmax.f32 %v1533_v16, 0.0  ;;  %v1567_v43 = vmax.f32 %v1535_v10, 0.0 }
 0x217   : > { %v1320_v60 = vadd.f32 %v1319_v36, %v1129_v21  ;;  %v1321_v34 = vpop.f32.mrb[5].mxu1  ;;  %v1233_v7 = vadd.f32 %v1232_v41, %v1128_v0  ;;  %v2681_v45 = vpack.c.bf16 %v1564_v50, %v1556_v37  ;;  %v2689_v55 = vpack.c.bf16 %v1566_v42, %v1558_v17  ;;  %v4682_v42 = vld [vmem:[#allocation31_spill] sm:$0xff] }
 0x218   : > { %v1322_v44 = vadd.f32 %v1321_v34, %v1130_v6  ;;  %v2679_v8 = vpack.c.bf16 %v1565_v9, %v1557_v56  ;;  %v2687_v58 = vpack.c.bf16 %v1567_v43, %v1559_v25  ;;  %v1540_v57 = vadd.f32 %v4128_v31, %v1231_v53  ;;  %v4681_v25 = vld [vmem:[#allocation22_spill] sm:$0xff] }
 0x219   : > { %v1236_v48 = vpop.f32.mrb[6].mxu0  ;;  %v1542_v11 = vadd.f32 %v4128_v31, %v1320_v60  ;;  %v1541_v3 = vadd.f32 %v4128_v31, %v1233_v7  ;;  %v1115_v52 = vmul.f32 %v4088_v40, %v4681_v25  ;;  %v1116_v53 = vmul.f32 %v4088_v40, %v4682_v42 }
 0x21a   : > { %v1237_v1 = vadd.f32 %v1236_v48, %v1135_v32  ;;  %v1325_v13 = vpop.f32.mrb[6].mxu1  ;;  %v1238_v46 = vpop.f32.mrb[7].mxu0  ;;  %2680 = vmatprep.subr.bf16.mxu0 %v2679_v8  ;;  %2688 = vmatprep.subr.bf16.mxu1 %v2687_v58  ;;  %v1543_v27 = vadd.f32 %v4128_v31, %v1322_v44  ;;  %v1572_v21 = vmax.f32 %v1540_v57, 0.0  ;;  %v1123_v7 = vmul.f32 %v4086_v30, %v4681_v25  ;;  %v4684_v48 = vld [vmem:[#allocation30_spill] sm:$0xff] }
 0x21b   : > { %v1326_v23 = vadd.f32 %v1325_v13, %v1137_v24  ;;  %v1239_v47 = vadd.f32 %v1238_v46, %v1136_v12  ;;  %v1327_v54 = vpop.f32.mrb[7].mxu1  ;;  %2682 = vmatpush1.bf16.msra.mxu0 %v2681_v45  ;;  %2690 = vmatpush1.bf16.msra.mxu1 %v2689_v55  ;;  %v1574_v15 = vmax.f32 %v1542_v11, 0.0  ;;  %v1573_v35 = vmax.f32 %v1541_v3, 0.0  ;;  %v4683_v45 = vld [vmem:[#allocation25_spill] sm:$0xff] }
 0x21c   : > { %v1548_v20 = vadd.f32 %v4142_v18, %v1237_v1  ;;  %v1328_v22 = vadd.f32 %v1327_v54, %v1138_v14  ;;  %v1575_v16 = vmax.f32 %v1543_v27, 0.0  ;;  %v1117_v55 = vmul.f32 %v4088_v40, %v4683_v45 }
 0x21d   : > { %v1550_v59 = vadd.f32 %v4142_v18, %v1326_v23  ;;  %v1549_v4 = vadd.f32 %v4142_v18, %v1239_v47  ;;  %v1124_v32 = vmul.f32 %v4086_v30, %v4682_v42  ;;  %v1118_v24 = vmul.f32 %v4088_v40, %v4684_v48 }
 0x21e   : > { %v1580_v0 = vmax.f32 %v1548_v20, 0.0  ;;  %v1551_v6 = vadd.f32 %v4142_v18, %v1328_v22  ;;  %v1125_v14 = vmul.f32 %v4086_v30, %v4683_v45  ;;  %v1126_v3 = vmul.f32 %v4086_v30, %v4684_v48 }
 0x21f   : > { %v1582_v37 = vmax.f32 %v1550_v59, 0.0  ;;  %v1581_v17 = vmax.f32 %v1549_v4, 0.0  ;;  %v1131_v40 = vmul.f32 %v4090_v38, %v4681_v25  ;;  %v1133_v30 = vmul.f32 %v4090_v38, %v4683_v45 }
 0x220   : > { %v2685_v10 = vpack.c.bf16 %v1580_v0, %v1572_v21  ;;  %v1583_v56 = vmax.f32 %v1551_v6, 0.0  ;;  %v1132_v20 = vmul.f32 %v4090_v38, %v4682_v42  ;;  %v1139_v22 = vmul.f32 %v4092_v63, %v4681_v25 }
 0x221   : > { %v2693_v36 = vpack.c.bf16 %v1582_v37, %v1574_v15  ;;  %v2683_v60 = vpack.c.bf16 %v1581_v17, %v1573_v35 }
 0x222   : > { %v1396_v50 = vpop.f32.mrb[8].mxu0  ;;  %v2691_v9 = vpack.c.bf16 %v1583_v56, %v1575_v16 }
 0x223   : > { %v1397_v41 = vadd.f32 %v1396_v50, %v1115_v52  ;;  %v1398_v34 = vpop.f32.mrb[9].mxu0  ;;  %2684 = vmatprep.subr.bf16.mxu0 %v2683_v60 }
 0x224   : > { %v1399_v43 = vadd.f32 %v1398_v34, %v1116_v53  ;;  %2692 = vmatprep.subr.bf16.mxu1 %v2691_v9  ;;  %2686 = vmatpush1.bf16.msra.mxu0 %v2685_v10  ;;  %v1134_v53 = vmul.f32 %v4090_v38, %v4684_v48 }
 0x225   : > { %2694 = vmatpush1.bf16.msra.mxu1 %v2693_v36  ;;  %v1528_v8 = vadd.f32 %v4102_v49, %v1397_v41  ;;  %v1140_v41 = vmul.f32 %v4092_v63, %v4682_v42 }
 0x226   : > { %v1402_v44 = vpop.f32.mrb[10].mxu0  ;;  %v1485_v58 = vpop.f32.mrb[8].mxu1  ;;  %v1529_v1 = vadd.f32 %v4102_v49, %v1399_v43 }
 0x227   : > { %v1403_v12 = vadd.f32 %v1402_v44, %v1123_v7  ;;  %v1404_v57 = vpop.f32.mrb[11].mxu0  ;;  %v1486_v11 = vadd.f32 %v1485_v58, %v1117_v55  ;;  %v1487_v13 = vpop.f32.mrb[9].mxu1  ;;  %2621 = vmatmul.mubr.msk.f32.vlgmr.msra.gmra.mrb[16].mxu0 %vm1143_vm0, %v4062_v33  ;;  %v1560_v59 = vmax.f32 %v1528_v8, 0.0 }
 0x228   : > { %v1405_v46 = vadd.f32 %v1404_v57, %v1124_v32  ;;  %v1488_v23 = vadd.f32 %v1487_v13, %v1118_v24  ;;  %2625 = vmatmul.mubr.msk.f32.vlgmr.msra.gmra.mrb[16].mxu1 %vm1143_vm0, %v4062_v33  ;;  %1723 = vmatprep.mubr.f32.mxu0 %v4663_v61  ;;  %v1561_v35 = vmax.f32 %v1529_v1, 0.0  ;;  %v1141_v1 = vmul.f32 %v4092_v63, %v4683_v45 }
 0x229   : > { %v1536_v47 = vadd.f32 %v4108_v26, %v1403_v12  ;;  %1812 = vmatprep.mubr.f32.mxu1 %v4663_v61  ;;  %v1530_v4 = vadd.f32 %v4102_v49, %v1486_v11 }
 0x22a   : > { %v1537_v54 = vadd.f32 %v4108_v26, %v1405_v46  ;;  %v1408_v27 = vpop.f32.mrb[12].mxu0  ;;  %v1491_v0 = vpop.f32.mrb[10].mxu1  ;;  %v1531_v56 = vadd.f32 %v4102_v49, %v1488_v23 }
 0x22b   : > { %v1568_v21 = vmax.f32 %v1536_v47, 0.0  ;;  %v1409_v6 = vadd.f32 %v1408_v27, %v1131_v40  ;;  %v1410_v15 = vpop.f32.mrb[13].mxu0  ;;  %v1492_v37 = vadd.f32 %v1491_v0, %v1125_v14  ;;  %v1493_v16 = vpop.f32.mrb[11].mxu1  ;;  %2622 = vmatmul.mubr.msk.f32.gmra.mrb[18].mxu0 %vm1143_vm0, %v4065_v19  ;;  %v1562_v49 = vmax.f32 %v1530_v4, 0.0 }
 0x22c   : > { %v1569_v17 = vmax.f32 %v1537_v54, 0.0  ;;  %v1411_v10 = vadd.f32 %v1410_v15, %v1132_v20  ;;  %v1494_v36 = vadd.f32 %v1493_v16, %v1126_v3  ;;  %2626 = vmatmul.mubr.msk.f32.gmra.mrb[18].mxu1 %vm1143_vm0, %v4065_v19  ;;  %1729 = vmatprep.mubr.f32.mxu0 %v4663_v61  ;;  %v1563_v12 = vmax.f32 %v1531_v56, 0.0 }
 0x22d   : > { %v2697_v52 = vpack.c.bf16 %v1568_v21, %v1560_v59  ;;  %v1538_v50 = vadd.f32 %v4108_v26, %v1492_v37  ;;  %1818 = vmatprep.mubr.f32.mxu1 %v4663_v61  ;;  %v1544_v43 = vadd.f32 %v4128_v31, %v1409_v6  ;;  %v1142_v47 = vmul.f32 %v4092_v63, %v4684_v48 }
 0x22e   : > { %v1414_v60 = vpop.f32.mrb[14].mxu0  ;;  %v2695_v34 = vpack.c.bf16 %v1569_v17, %v1561_v35  ;;  %v1539_v9 = vadd.f32 %v4108_v26, %v1494_v36  ;;  %v1497_v7 = vpop.f32.mrb[12].mxu1  ;;  %v1545_v58 = vadd.f32 %v4128_v31, %v1411_v10 }
 0x22f   : > { %v1415_v55 = vadd.f32 %v1414_v60, %v1139_v22  ;;  %v1416_v44 = vpop.f32.mrb[15].mxu0  ;;  %v1570_v32 = vmax.f32 %v1538_v50, 0.0  ;;  %v1498_v8 = vadd.f32 %v1497_v7, %v1133_v30  ;;  %v1499_v38 = vpop.f32.mrb[13].mxu1  ;;  %2623 = vmatmul.mubr.msk.f32.gmra.mrb[20].mxu0 %vm1143_vm0, %v4071_v28  ;;  %v1576_v46 = vmax.f32 %v1544_v43, 0.0 }
 0x230   : > { %v1417_v24 = vadd.f32 %v1416_v44, %v1140_v41  ;;  %2696 = vmatprep.subr.bf16.mxu0 %v2695_v34  ;;  %v1571_v14 = vmax.f32 %v1539_v9, 0.0  ;;  %v1500_v57 = vadd.f32 %v1499_v38, %v1134_v53  ;;  %2627 = vmatmul.mubr.msk.f32.gmra.mrb[20].mxu1 %vm1143_vm0, %v4071_v28  ;;  %v1577_v27 = vmax.f32 %v1545_v58, 0.0 }
 0x231   : > { %v1552_v26 = vadd.f32 %v4142_v18, %v1415_v55  ;;  %2698 = vmatpush1.bf16.msra.mxu0 %v2697_v52  ;;  %v2705_v11 = vpack.c.bf16 %v1570_v32, %v1562_v49  ;;  %1735 = vmatprep.mubr.f32.mxu0 %v4663_v61  ;;  %v1546_v54 = vadd.f32 %v4128_v31, %v1498_v8 }
 0x232   : > { %v1553_v13 = vadd.f32 %v4142_v18, %v1417_v24  ;;  %1824 = vmatprep.mubr.f32.mxu1 %v4663_v61  ;;  %v1503_v23 = vpop.f32.mrb[14].mxu1  ;;  %v2703_v40 = vpack.c.bf16 %v1571_v14, %v1563_v12  ;;  %v1547_v59 = vadd.f32 %v4128_v31, %v1500_v57 }
 0x233   : > { %v1584_v3 = vmax.f32 %v1552_v26, 0.0  ;;  %v1504_v30 = vadd.f32 %v1503_v23, %v1141_v1  ;;  %v1505_v22 = vpop.f32.mrb[15].mxu1  ;;  %2624 = vmatmul.mubr.msk.f32.gmra.mrb[22].mxu0 %vm1143_vm0, %v4067_v39  ;;  %v1578_v15 = vmax.f32 %v1546_v54, 0.0 }
 0x234   : > { %v1585_v20 = vmax.f32 %v1553_v13, 0.0  ;;  %v1506_v21 = vadd.f32 %v1505_v22, %v1142_v47  ;;  %2704 = vmatprep.subr.bf16.mxu1 %v2703_v40  ;;  %2628 = vmatmul.mubr.msk.f32.gmra.mrb[22].mxu1 %vm1143_vm0, %v4067_v39  ;;  %v1579_v31 = vmax.f32 %v1547_v59, 0.0 }
 0x235   : > { %v2701_v4 = vpack.c.bf16 %v1584_v3, %v1576_v46  ;;  %v1554_v63 = vadd.f32 %v4142_v18, %v1504_v30  ;;  %2706 = vmatpush1.bf16.msra.mxu1 %v2705_v11  ;;  %1895 = vmatprep.mubr.f32.mxu0 %v4663_v61 }
 0x236   : > { %v2699_v0 = vpack.c.bf16 %v1585_v20, %v1577_v27  ;;  %v1555_v6 = vadd.f32 %v4142_v18, %v1506_v21  ;;  %1984 = vmatprep.mubr.f32.mxu1 %v4663_v61 }
 0x237   : > { %v1586_v35 = vmax.f32 %v1554_v63, 0.0 }
 0x238   : > { %2700 = vmatprep.subr.bf16.mxu0 %v2699_v0  ;;  %v1587_v37 = vmax.f32 %v1555_v6, 0.0 }
 0x239   : > { %2702 = vmatpush1.bf16.msra.mxu0 %v2701_v4  ;;  %v2709_v17 = vpack.c.bf16 %v1586_v35, %v1578_v15 }
 0x23a   : > { %v2707_v16 = vpack.c.bf16 %v1587_v37, %v1579_v31 }
 0x23c   : > { %2629 = vmatmul.mubr.msk.f32.vlgmr.msra.gmra.mrb[24].mxu0 %vm1143_vm0, %v4062_v33  ;;  %2708 = vmatprep.subr.bf16.mxu1 %v2707_v16 }
 0x23d   : > { %1901 = vmatprep.mubr.f32.mxu0 %v4663_v61  ;;  %2710 = vmatpush1.bf16.msra.mxu1 %v2709_v17 }
 0x240   : > { %2630 = vmatmul.mubr.msk.f32.gmra.mrb[26].mxu0 %vm1143_vm0, %v4065_v19  ;;  %2633 = vmatmul.mubr.msk.f32.vlgmr.msra.gmra.mrb[24].mxu1 %vm1143_vm0, %v4062_v33  ;;  %v4246_v33 = vpop.permute.xlu1 %1600 }
 0x241   : > { %1907 = vmatprep.mubr.f32.mxu0 %v4663_v61  ;;  %1990 = vmatprep.mubr.f32.mxu1 %v4663_v61  ;;  %v1621_v34 = vmul.f32 %v4246_v33, %v4677_v2  ;;  %v1623_v7 = vmul.f32 %v4246_v33, %v4678_v51  ;;  %v1622_v55 = vmul.f32 %v4246_v33, %v4679_v62 }
 0x242   : > { %v1624_v32 = vmul.f32 %v4246_v33, %v4680_v5 }
 0x244   : > { %2631 = vmatmul.mubr.msk.f32.gmra.mrb[28].mxu0 %vm1143_vm0, %v4071_v28  ;;  %2634 = vmatmul.mubr.msk.f32.gmra.mrb[26].mxu1 %vm1143_vm0, %v4065_v19  ;;  %v4248_v19 = vpop.permute.xlu0 %1595  ;;  %v4250_v18 = vpop.permute.xlu1 %1605 }
 0x245   : > { %1913 = vmatprep.mubr.f32.mxu0 %v4663_v61  ;;  %1996 = vmatprep.mubr.f32.mxu1 %v4663_v61  ;;  %v1613_v10 = vmul.f32 %v4248_v19, %v4677_v2  ;;  %v1614_v52 = vmul.f32 %v4248_v19, %v4679_v62  ;;  %v1629_v8 = vmul.f32 %v4250_v18, %v4677_v2 }
 0x246   : > { %v1631_v24 = vmul.f32 %v4250_v18, %v4678_v51  ;;  %v1630_v12 = vmul.f32 %v4250_v18, %v4679_v62  ;;  %v1632_v13 = vmul.f32 %v4250_v18, %v4680_v5 }
 0x248   : > { %2632 = vmatmul.mubr.msk.f32.gmra.mrb[30].mxu0 %vm1143_vm0, %v4067_v39  ;;  %2635 = vmatmul.mubr.msk.f32.gmra.mrb[28].mxu1 %vm1143_vm0, %v4071_v28  ;;  %v1615_v28 = vmul.f32 %v4248_v19, %v4678_v51  ;;  %v4256_v56 = vpop.permute.xlu0 %1610  ;;  %v4262_v50 = vpop.permute.xlu1 %2010 }
 0x249   : > { %2170 = vmatprep.mubr.f32.mxu0 %v4663_v61  ;;  %2002 = vmatprep.mubr.f32.mxu1 %v4663_v61  ;;  %v1637_v46 = vmul.f32 %v4256_v56, %v4677_v2  ;;  %v1639_v54 = vmul.f32 %v4256_v56, %v4678_v51  ;;  %v1638_v27 = vmul.f32 %v4256_v56, %v4679_v62 }
 0x24a   : > { %v1640_v20 = vmul.f32 %v4256_v56, %v4680_v5 }
 0x24c   : > { %2636 = vmatmul.mubr.msk.f32.gmra.mrb[30].mxu1 %vm1143_vm0, %v4067_v39  ;;  %v1616_v39 = vmul.f32 %v4248_v19, %v4680_v5  ;;  %v4274_v38 = vpop.permute.xlu0 %2014  ;;  %v4295_v2 = vpop.permute.xlu1 %2018 }
 0x24d   : > { %2241 = vmatprep.mubr.f32.mxu1 %v4663_v61 }
 0x2fa   : > { %v1719_v36 = vpop.f32.mrb[16].mxu0 }
 0x2fb   : > { %v1720_v53 = vadd.f32 %v1719_v36, %v1613_v10  ;;  %v1808_v60 = vpop.f32.mrb[16].mxu1  ;;  %v1721_v41 = vpop.f32.mrb[17].mxu0 }
 0x2fc   : > { %v1809_v49 = vadd.f32 %v1808_v60, %v1615_v28  ;;  %v1722_v9 = vadd.f32 %v1721_v41, %v1614_v52  ;;  %v1810_v43 = vpop.f32.mrb[17].mxu1 }
 0x2fd   : > { %v1811_v44 = vadd.f32 %v1810_v43, %v1616_v39  ;;  %v2025_v57 = vadd.f32 %v4262_v50, %v1720_v53 }
 0x2fe   : > { %v1725_v58 = vpop.f32.mrb[18].mxu0  ;;  %v2026_v14 = vadd.f32 %v4262_v50, %v1722_v9  ;;  %v2027_v3 = vadd.f32 %v4262_v50, %v1809_v49 }
 0x2ff   : > { %v1726_v26 = vadd.f32 %v1725_v58, %v1621_v34  ;;  %v1814_v11 = vpop.f32.mrb[18].mxu1  ;;  %v1727_v1 = vpop.f32.mrb[19].mxu0  ;;  %v2028_v22 = vadd.f32 %v4262_v50, %v1811_v44  ;;  %v2057_v0 = vmax.f32 %v2025_v57, 0.0 }
 0x300   : > { %v1815_v23 = vadd.f32 %v1814_v11, %v1623_v7  ;;  %v1728_v47 = vadd.f32 %v1727_v1, %v1622_v55  ;;  %v1816_v40 = vpop.f32.mrb[19].mxu1  ;;  %v2058_v63 = vmax.f32 %v2026_v14, 0.0  ;;  %v2059_v5 = vmax.f32 %v2027_v3, 0.0 }
 0x301   : > { %v1817_v30 = vadd.f32 %v1816_v40, %v1624_v32  ;;  %v2033_v59 = vadd.f32 %v4274_v38, %v1726_v26  ;;  %v2060_v39 = vmax.f32 %v2028_v22, 0.0 }
 0x302   : > { %v1731_v4 = vpop.f32.mrb[20].mxu0  ;;  %v2034_v21 = vadd.f32 %v4274_v38, %v1728_v47  ;;  %v2035_v51 = vadd.f32 %v4274_v38, %v1815_v23 }
 0x303   : > { %v1732_v6 = vadd.f32 %v1731_v4, %v1629_v8  ;;  %v1820_v15 = vpop.f32.mrb[20].mxu1  ;;  %v1733_v62 = vpop.f32.mrb[21].mxu0  ;;  %v2036_v35 = vadd.f32 %v4274_v38, %v1817_v30  ;;  %v2065_v31 = vmax.f32 %v2033_v59, 0.0 }
 0x304   : > { %v1821_v37 = vadd.f32 %v1820_v15, %v1631_v24  ;;  %v1734_v17 = vadd.f32 %v1733_v62, %v1630_v12  ;;  %v1822_v16 = vpop.f32.mrb[21].mxu1  ;;  %v2066_v10 = vmax.f32 %v2034_v21, 0.0  ;;  %v2067_v28 = vmax.f32 %v2035_v51, 0.0  ;;  %v4303_v8 = vpop.permute.xlu1 %2022 }
 0x305   : > { %v1823_v52 = vadd.f32 %v1822_v16, %v1632_v13  ;;  %v2068_v36 = vmax.f32 %v2036_v35, 0.0  ;;  %v2713_v53 = vpack.c.bf16 %v2065_v31, %v2057_v0  ;;  %v2041_v49 = vadd.f32 %v4295_v2, %v1732_v6 }
 0x306   : > { %v1737_v60 = vpop.f32.mrb[22].mxu0  ;;  %v2711_v41 = vpack.c.bf16 %v2066_v10, %v2058_v63  ;;  %v2721_v34 = vpack.c.bf16 %v2067_v28, %v2059_v5  ;;  %v2043_v44 = vadd.f32 %v4295_v2, %v1821_v37  ;;  %v2042_v32 = vadd.f32 %v4295_v2, %v1734_v17 }
 0x307   : > { %v1738_v9 = vadd.f32 %v1737_v60, %v1637_v46  ;;  %v1826_v43 = vpop.f32.mrb[22].mxu1  ;;  %v1739_v7 = vpop.f32.mrb[23].mxu0  ;;  %v2719_v55 = vpack.c.bf16 %v2068_v36, %v2060_v39  ;;  %v2044_v14 = vadd.f32 %v4295_v2, %v1823_v52  ;;  %v2073_v13 = vmax.f32 %v2041_v49, 0.0 }
 0x308   : > { %v1827_v58 = vadd.f32 %v1826_v43, %v1639_v54  ;;  %v1740_v24 = vadd.f32 %v1739_v7, %v1638_v27  ;;  %v1828_v12 = vpop.f32.mrb[23].mxu1  ;;  %2712 = vmatprep.subr.bf16.mxu0 %v2711_v41  ;;  %v2075_v23 = vmax.f32 %v2043_v44, 0.0  ;;  %v2074_v47 = vmax.f32 %v2042_v32, 0.0 }
 0x309   : > { %v2049_v57 = vadd.f32 %v4303_v8, %v1738_v9  ;;  %v1829_v26 = vadd.f32 %v1828_v12, %v1640_v20  ;;  %2720 = vmatprep.subr.bf16.mxu1 %v2719_v55  ;;  %2714 = vmatpush1.bf16.msra.mxu0 %v2713_v53  ;;  %v2076_v27 = vmax.f32 %v2044_v14, 0.0  ;;  %v1617_v20 = vmul.f32 %v4248_v19, %v4681_v25 }
 0x30a   : > { %v2051_v11 = vadd.f32 %v4303_v8, %v1827_v58  ;;  %v2050_v1 = vadd.f32 %v4303_v8, %v1740_v24  ;;  %2722 = vmatpush1.bf16.msra.mxu1 %v2721_v34  ;;  %v1618_v21 = vmul.f32 %v4248_v19, %v4682_v42  ;;  %v1625_v62 = vmul.f32 %v4246_v33, %v4681_v25 }
 0x30b   : > { %v2081_v46 = vmax.f32 %v2049_v57, 0.0  ;;  %v2052_v3 = vadd.f32 %v4303_v8, %v1829_v26  ;;  %v1619_v35 = vmul.f32 %v4248_v19, %v4683_v45  ;;  %v1626_v5 = vmul.f32 %v4246_v33, %v4682_v42 }
 0x30c   : > { %v2083_v40 = vmax.f32 %v2051_v11, 0.0  ;;  %v2082_v54 = vmax.f32 %v2050_v1, 0.0  ;;  %v1620_v16 = vmul.f32 %v4248_v19, %v4684_v48  ;;  %v1627_v53 = vmul.f32 %v4246_v33, %v4683_v45 }
 0x30d   : > { %v2717_v30 = vpack.c.bf16 %v2081_v46, %v2073_v13  ;;  %v2084_v22 = vmax.f32 %v2052_v3, 0.0  ;;  %v1633_v49 = vmul.f32 %v4250_v18, %v4681_v25  ;;  %v1628_v9 = vmul.f32 %v4246_v33, %v4684_v48 }
 0x30e   : > { %v2725_v59 = vpack.c.bf16 %v2083_v40, %v2075_v23  ;;  %v2715_v63 = vpack.c.bf16 %v2082_v54, %v2074_v47  ;;  %v1635_v7 = vmul.f32 %v4250_v18, %v4683_v45  ;;  %v1634_v55 = vmul.f32 %v4250_v18, %v4682_v42 }
 0x30f   : > { %v1897_v4 = vpop.f32.mrb[24].mxu0  ;;  %v2723_v6 = vpack.c.bf16 %v2084_v22, %v2076_v27  ;;  %v1641_v23 = vmul.f32 %v4256_v56, %v4681_v25  ;;  %v1636_v47 = vmul.f32 %v4250_v18, %v4684_v48  ;;  %v1642_v54 = vmul.f32 %v4256_v56, %v4682_v42 }
 0x310   : > { %v1898_v0 = vadd.f32 %v1897_v4, %v1617_v20  ;;  %v1899_v51 = vpop.f32.mrb[25].mxu0  ;;  %2716 = vmatprep.subr.bf16.mxu0 %v2715_v63 }
 0x311   : > { %v1900_v15 = vadd.f32 %v1899_v51, %v1618_v21  ;;  %2724 = vmatprep.subr.bf16.mxu1 %v2723_v6  ;;  %2718 = vmatpush1.bf16.msra.mxu0 %v2717_v30 }
 0x312   : > { %2726 = vmatpush1.bf16.msra.mxu1 %v2725_v59  ;;  %v2029_v37 = vadd.f32 %v4262_v50, %v1898_v0 }
 0x313   : > { %v1903_v31 = vpop.f32.mrb[26].mxu0  ;;  %v1986_v17 = vpop.f32.mrb[24].mxu1  ;;  %v2030_v39 = vadd.f32 %v4262_v50, %v1900_v15 }
 0x314   : > { %v1904_v10 = vadd.f32 %v1903_v31, %v1625_v62  ;;  %v1905_v28 = vpop.f32.mrb[27].mxu0  ;;  %v1987_v52 = vadd.f32 %v1986_v17, %v1619_v35  ;;  %v1988_v36 = vpop.f32.mrb[25].mxu1  ;;  %2637 = vmatmul.mubr.msk.f32.vlgmr.msra.gmra.mrb[32].mxu0 %vm1143_vm0, %v4081_v29  ;;  %v2061_v44 = vmax.f32 %v2029_v37, 0.0  ;;  %v1644_v17 = vmul.f32 %v4256_v56, %v4684_v48 }
 0x315   : > { %v1906_v60 = vadd.f32 %v1905_v28, %v1626_v5  ;;  %v1989_v41 = vadd.f32 %v1988_v36, %v1620_v16  ;;  %2638 = vmatmul.mubr.msk.f32.vlgmr.msra.gmra.mrb[32].mxu1 %vm1143_vm0, %v4081_v29  ;;  %2312 = vmatprep.mubr.f32.mxu0 %v4663_v61  ;;  %v2062_v57 = vmax.f32 %v2030_v39, 0.0 }
 0x316   : > { %v2037_v34 = vadd.f32 %v4274_v38, %v1904_v10  ;;  %2383 = vmatprep.mubr.f32.mxu1 %v4663_v61  ;;  %v2031_v32 = vadd.f32 %v4262_v50, %v1987_v52 }
 0x317   : > { %v2038_v19 = vadd.f32 %v4274_v38, %v1906_v60  ;;  %v1909_v43 = vpop.f32.mrb[28].mxu0  ;;  %v1992_v24 = vpop.f32.mrb[26].mxu1  ;;  %v2032_v13 = vadd.f32 %v4262_v50, %v1989_v41 }
 0x318   : > { %v2069_v58 = vmax.f32 %v2037_v34, 0.0  ;;  %v1910_v12 = vadd.f32 %v1909_v43, %v1633_v49  ;;  %v1911_v14 = vpop.f32.mrb[29].mxu0  ;;  %v1993_v26 = vadd.f32 %v1992_v24, %v1627_v53  ;;  %v1994_v33 = vpop.f32.mrb[27].mxu1  ;;  %v2063_v30 = vmax.f32 %v2031_v32, 0.0 }
 0x319   : > { %v2070_v11 = vmax.f32 %v2038_v19, 0.0  ;;  %v1912_v1 = vadd.f32 %v1911_v14, %v1634_v55  ;;  %v1995_v3 = vadd.f32 %v1994_v33, %v1628_v9  ;;  %v2064_v18 = vmax.f32 %v2032_v13, 0.0 }
 0x31a   : > { %v2729_v46 = vpack.c.bf16 %v2069_v58, %v2061_v44  ;;  %v2039_v61 = vadd.f32 %v4274_v38, %v1993_v26  ;;  %v2045_v50 = vadd.f32 %v4295_v2, %v1910_v12  ;;  %v3043_v55 = vmov 1966171168   ;;  %v4686_v58 = vld [vmem:[#allocation20_spill] sm:$0xff]  ;;  %v4687_v12 = vld [vmem:[#allocation19_spill] sm:$0xff] }
 0x31b   : > { %v1915_v40 = vpop.f32.mrb[30].mxu0  ;;  %v2727_v27 = vpack.c.bf16 %v2070_v11, %v2062_v57  ;;  %v2040_v22 = vadd.f32 %v4274_v38, %v1995_v3  ;;  %v1998_v20 = vpop.f32.mrb[28].mxu1  ;;  %v2046_v63 = vadd.f32 %v4295_v2, %v1912_v1  ;;  %v1643_v38 = vmul.f32 %v4256_v56, %v4683_v45  ;;  %v4688_v57 = vld [vmem:[#allocation21_spill] sm:$0xff] }
 0x31c   : > { %v1916_v59 = vadd.f32 %v1915_v40, %v1641_v23  ;;  %v1917_v4 = vpop.f32.mrb[31].mxu0  ;;  %v2071_v21 = vmax.f32 %v2039_v61, 0.0  ;;  %v1999_v25 = vadd.f32 %v1998_v20, %v1635_v7  ;;  %v2000_v0 = vpop.f32.mrb[29].mxu1  ;;  %v2077_v31 = vmax.f32 %v2045_v50, 0.0 }
 0x31d   : > { %v1918_v51 = vadd.f32 %v1917_v4, %v1642_v54  ;;  %2728 = vmatprep.subr.bf16.mxu0 %v2727_v27  ;;  %v2072_v6 = vmax.f32 %v2040_v22, 0.0  ;;  %v2001_v15 = vadd.f32 %v2000_v0, %v1636_v47  ;;  %v2078_v28 = vmax.f32 %v2046_v63, 0.0  ;;  %v2392_v3 = vpop.permute.xlu1 %2391  ;;  %v4690_v63 = vld [vmem:[#allocation16_spill] sm:$0xff] }
 0x31e   : > { %v2053_v42 = vadd.f32 %v4303_v8, %v1916_v59  ;;  %2730 = vmatpush1.bf16.msra.mxu0 %v2729_v46  ;;  %v2737_v62 = vpack.c.bf16 %v2071_v21, %v2063_v30  ;;  %v2047_v10 = vadd.f32 %v4295_v2, %v1999_v25  ;;  %v2415_v44 = vunpack.c.l.s4 %v3043_v55  ;;  %v4689_v30 = vld [vmem:[#allocation15_spill] sm:$0xff] }
 0x31f   : > { %v2054_v35 = vadd.f32 %v4303_v8, %v1918_v51  ;;  %v2004_v37 = vpop.f32.mrb[30].mxu1  ;;  %v2735_v16 = vpack.c.bf16 %v2072_v6, %v2064_v18  ;;  %v2048_v53 = vadd.f32 %v4295_v2, %v2001_v15  ;;  %v2094_v2 = vpop.permute.xlu0 %2093  ;;  %v4691_v51 = vld [vmem:[#allocation24_spill] sm:$0xff] }
 0x320   : > { %v2085_v5 = vmax.f32 %v2053_v42, 0.0  ;;  %v2005_v52 = vadd.f32 %v2004_v37, %v1643_v38  ;;  %v2006_v36 = vpop.f32.mrb[31].mxu1  ;;  %v2079_v19 = vmax.f32 %v2047_v10, 0.0  ;;  %v2098_v24 = vmul.f32 %v2094_v2, %v4686_v58 }
 0x321   : > { %v2086_v39 = vmax.f32 %v2054_v35, 0.0  ;;  %v2007_v41 = vadd.f32 %v2006_v36, %v1644_v17  ;;  %2736 = vmatprep.subr.bf16.mxu1 %v2735_v16  ;;  %v2080_v56 = vmax.f32 %v2048_v53, 0.0  ;;  %v2097_v14 = vmul.f32 %v2094_v2, %v4687_v12 }
 0x322   : > { %v2733_v60 = vpack.c.bf16 %v2085_v5, %v2077_v31  ;;  %v2055_v45 = vadd.f32 %v4303_v8, %v2005_v52  ;;  %2738 = vmatpush1.bf16.msra.mxu1 %v2737_v62  ;;  %v2099_v26 = vmul.f32 %v2094_v2, %v4688_v57  ;;  %v2416_v33 = vunpack.c.0.s8 %v2415_v44  ;;  %v4692_v62 = vld [vmem:[#allocation17_spill] sm:$0xff]  ;;  %v4693_v5 = vld [vmem:[#allocation23_spill] sm:$0xff] }
 0x323   : > { %v2731_v34 = vpack.c.bf16 %v2086_v39, %v2078_v28  ;;  %v2056_v49 = vadd.f32 %v4303_v8, %v2007_v41  ;;  %v4685_v8 = vld [vmem:[#allocation18_spill] sm:$0xff]  ;;  %v2100_v0 = vmul.f32 %v2094_v2, %v4690_v63  ;;  %v2101_v18 = vmul.f32 %v2094_v2, %v4691_v51 }
 0x324   : > { %v2087_v48 = vmax.f32 %v2055_v45, 0.0  ;;  %v2096_v32 = vmul.f32 %v2094_v2, %v4685_v8  ;;  %v2419_v22 = vsub.s32 %v2416_v33, %v4689_v30  ;;  %v2102_v38 = vmul.f32 %v2094_v2, %v4692_v62 }
 0x325   : > { %2732 = vmatprep.subr.bf16.mxu0 %v2731_v34  ;;  %v2088_v9 = vmax.f32 %v2056_v49, 0.0  ;;  %v2103_v37 = vmul.f32 %v2094_v2, %v4693_v5 }
 0x326   : > { %2734 = vmatpush1.bf16.msra.mxu0 %v2733_v60  ;;  %v2741_v43 = vpack.c.bf16 %v2087_v48, %v2079_v19 }
 0x327   : > { %v2739_v7 = vpack.c.bf16 %v2088_v9, %v2080_v56 }
 0x329   : > { %2639 = vmatmul.mubr.msk.f32.vlgmr.msra.gmra.mrb[34].mxu0 %vm1143_vm0, %v4081_v29  ;;  %2740 = vmatprep.subr.bf16.mxu1 %v2739_v7 }
 0x32a   : > { %2742 = vmatpush1.bf16.msra.mxu1 %v2741_v43 }
 0x32d   : > { %2640 = vmatmul.mubr.msk.f32.vlgmr.msra.gmra.mrb[34].mxu1 %vm1143_vm0, %v4081_v29 }
 0x3e7   : > { %v2172_v11 = vpop.f32.mrb[32].mxu0 }
 0x3e8   : > { %v2173_v1 = vadd.f32 %v2172_v11, %v2096_v32  ;;  %v2243_v13 = vpop.f32.mrb[32].mxu1  ;;  %v2174_v46 = vpop.f32.mrb[33].mxu0 }
 0x3e9   : > { %v2244_v23 = vadd.f32 %v2243_v13, %v2098_v24  ;;  %v2175_v61 = vadd.f32 %v2174_v46, %v2097_v14  ;;  %v2245_v29 = vpop.f32.mrb[33].mxu1 }
 0x3ea   : > { %v2394_v47 = vadd.f32 %v2392_v3, %v2173_v1  ;;  %v2246_v40 = vadd.f32 %v2245_v29, %v2099_v26 }
 0x3eb   : > { %v2396_v54 = vadd.f32 %v2392_v3, %v2244_v23  ;;  %v2395_v27 = vadd.f32 %v2392_v3, %v2175_v61 }
 0x3ec   : > { %v2397_v50 = vadd.f32 %v2392_v3, %v2246_v40 }
 0x3ed   : > { %v2410_v20 = vcombine.low %v2394_v47, %v2395_v27 }
 0x3ee   : > { %v2411_v59 = vcombine.low %v2396_v54, %v2397_v50 }
 0x3ef   : > { %v2420_v4 = vrot.slane %v2410_v20, %v2419_v22 }
 0x3f0   : > { %v2427_v21 = vrot.slane %v2411_v59, %v2419_v22 }
 0x3f2   : > { %v2442_v25 = vcombine.low %v2420_v4, %v2427_v21 }
 0x3f4   : > { %v2450_v49 = vrot.slane %v2442_v25, %v2419_v22 }
 0x3fc   : > { %v2314_v6 = vpop.f32.mrb[34].mxu0 }
 0x3fd   : > { %v2315_v15 = vadd.f32 %v2314_v6, %v2100_v0  ;;  %v2316_v42 = vpop.f32.mrb[35].mxu0 }
 0x3fe   : > { %v2317_v35 = vadd.f32 %v2316_v42, %v2101_v18 }
 0x3ff   : > { %v2398_v31 = vadd.f32 %v2392_v3, %v2315_v15 }
 0x400   : > { %v2399_v17 = vadd.f32 %v2392_v3, %v2317_v35  ;;  %v2385_v16 = vpop.f32.mrb[34].mxu1 }
 0x401   : > { %v2386_v10 = vadd.f32 %v2385_v16, %v2102_v38  ;;  %v2387_v52 = vpop.f32.mrb[35].mxu1 }
 0x402   : > { %v2412_v28 = vcombine.low %v2398_v31, %v2399_v17  ;;  %v2388_v39 = vadd.f32 %v2387_v52, %v2103_v37 }
 0x403   : > { %v2400_v36 = vadd.f32 %v2392_v3, %v2386_v10 }
 0x404   : > { %v2401_v53 = vadd.f32 %v2392_v3, %v2388_v39  ;;  %v2434_v60 = vrot.slane %v2412_v28, %v2419_v22 }
 0x406   : > { %v2413_v41 = vcombine.low %v2400_v36, %v2401_v53 }
 0x408   : > { %v2441_v45 = vrot.slane %v2413_v41, %v2419_v22 }
 0x40a   : > { %v2443_v34 = vcombine.low %v2434_v60, %v2441_v45 }
 0x40c   : > { %v2457_v19 = vrot.slane %v2443_v34, %v2419_v22 }
 0x40e   : > { %v2458_v48 = vcombine.low %v2450_v49, %v2457_v19 }
 0x410   : > { %2460 = vst [vmem:[%s243_s7] sm:$0xff] %v2458_v48 }
 0x411   : > { %2940 = shalt.err (!%p2937_p2)
}
 0x412   : > { %s2941_s23 = scalar_lea.hbm %s4383_s20, 128  ;;  %s2945_s21 = scalar_lea.hbm %s4440_s3, 512 }
 0x413   : > { %p2942_p4 = scmp.ne.s32.totalorder %s4383_s20, %s2941_s23  ;;  %p2946_p0 = scmp.lt.u32.totalorder %s4383_s20, %s4440_s3 }
 0x414   : > { %p2947_p6 = scmp.lt.u32.totalorder %s2945_s21, %s2941_s23  ;;  %p2949_p10 = scmp.lt.u32.totalorder %s2941_s23, %s4383_s20 }
 0x415   : > { %p2943_p9 = pnand %p2942_p4, %p3170_p11 }
 0x416   : > { %p2948_p8 = por %p2947_p6, %p2946_p0 }
 0x417   : > { %p2944_p5 = pneg %p2943_p9 }
 0x418   : > { %p2950_p12 = por %p2949_p10, %p2948_p8 }
 0x41a   : > { %p2951_p13 = pnand %p2950_p12, %p2944_p5 }
 0x41c   : > { %2954 = shalt.err (!%p2951_p13)
}
 0x41d   : > { %2749 = dma.vmem_to_hbm [thread:$0]  (%p3170_p11), %s4385_s9, 128, %s4383_s20, %s2462_s16  }
 0x41e PF: > { %s4694_s28 = sld [smem:[#allocation12_spill]]  ;;  %p2766_p3 = scmp.ge.s32.totalorder %s3029_s19, 2 }
 0x41f   : > { %s2490_s15 = sand.u32 1, %s3001_s12  }
 0x420   : > { %s2491_s17 = scalar_lea.sflag [#allocation4], %s2490_s15 }
 0x424   : > { %p4695_p7 = scmp.ne.s32.totalorder %s4694_s28, 0 }
 0x426   : > { %p2760_p1 = pnand %p2766_p3, %p4695_p7 }
 0x428   : > { %2996 = dma.done.wait (!%p2760_p1), %s2491_s17, 128  }
 0x429   : > { %2998 = vsyncadd (!%p2760_p1), %s2491_s17, 4294967168  ;;  %s20_s19 = sadd.s32 1, %s3029_s19   ;;  %s4696_s15 = sld [smem:[#allocation11_spill]] }
 0x42a   : > { %p17_p2 = scmp.ge.s32.totalorder %s20_s19, 6   ;;  %s4697_s17 = sld [smem:[#allocation13_spill]] }
 0x42b   : > { %s4698_s29 = sld [smem:[#allocation14_spill]]  ;;  %s4699_s12 = smov %s3005_s13 }
 0x42c   : > { %s4700_s13 = smov %s3009_s14  ;;  %s4701_s14 = smov %s3187_s27 }
 0x42d   : > { %s4702_s16 = smov %s3025_s18  ;;  %19 = sbr.rel (!%p17_p2) target bundleno = 10 (0xa), region = 87 }
 0x431   : > { %s4703_s18 = smov %s4698_s29 }
 0x434   :  { %2496 = vsyncpa [#allocation3], 1 }
 0x435   :  { %2498 = vsyncpa [#allocation3 + $0x1], 1 }
 0x436   :  { %2499 = vsyncpa [#allocation6], 1 }
 0x437   :  { %2500 = vsyncpa [#allocation4], 1 }
 0x438   :  { %2502 = vsyncpa [#allocation4 + $0x1], 1 }

</bundles_post_ra>
